<compile_context>
chip_gen: v6e
topology: v6e:2x2x1
jax: 0.10.0
libtpu: 0.0.40
codegen_flags: <defaults>
</compile_context>

<pallas_src>
import functools

import jax
import jax.numpy as jnp
from jax.experimental import pallas as pl
from jax.experimental.pallas import tpu as pltpu

_LANE = 128
_VMEM_LIMIT = 48 * 1024 * 1024


def _round_up(x, m):
    return ((x + m - 1) // m) * m


# ---------------------------------------------------------------------------
# Kernel 1: generic NHWC "valid" conv as an implicit GEMM, optional fused ReLU.
#   x_ref: (Hin, Win, Cin)       one batch image (batch dim squeezed by BlockSpec)
#   w_ref: (kh*kw, Cin, Cout_p)  tap-major weights, Cout zero-padded to 128*k
#   o_ref: (Ho, Wo, Cout_p)
# ---------------------------------------------------------------------------
def _conv_nhwc_kernel(x_ref, w_ref, o_ref, *, kh, kw, apply_relu):
    Ho, Wo, Cop = o_ref.shape

    def row_body(h, carry):
        acc = jnp.zeros((Wo, Cop), jnp.float32)
        for i in range(kh):
            for j in range(kw):
                a = x_ref[h + i, pl.ds(j, Wo), :].astype(jnp.bfloat16)
                acc = acc + jnp.dot(a, w_ref[i * kw + j],
                                    preferred_element_type=jnp.float32)
        if apply_relu:
            acc = jnp.maximum(acc, 0.0)
        o_ref[h] = acc.astype(o_ref.dtype)
        return carry

    jax.lax.fori_loop(0, Ho, row_body, 0)


def conv2d_nhwc(x, w_taps, kh, kw, apply_relu=False):
    """x: (N, Hin, Win, Cin) f32; w_taps: (kh*kw, Cin, Cout_p) bf16."""
    N, Hin, Win, Cin = x.shape
    nk, _, Cop = w_taps.shape
    assert nk == kh * kw
    Ho, Wo = Hin - kh + 1, Win - kw + 1
    cost = pl.CostEstimate(
        flops=2 * N * Ho * Wo * Cin * Cop * kh * kw,
        transcendentals=0,
        bytes_accessed=int(x.size * 4 + w_taps.size * 2 + N * Ho * Wo * Cop * 4),
    )
    return pl.pallas_call(
        functools.partial(_conv_nhwc_kernel, kh=kh, kw=kw, apply_relu=apply_relu),
        out_shape=jax.ShapeDtypeStruct((N, Ho, Wo, Cop), jnp.float32),
        grid=(N,),
        in_specs=[
            pl.BlockSpec((None, Hin, Win, Cin), lambda n: (n, 0, 0, 0)),
            pl.BlockSpec((nk, Cin, Cop), lambda n: (0, 0, 0)),
        ],
        out_specs=pl.BlockSpec((None, Ho, Wo, Cop), lambda n: (n, 0, 0, 0)),
        compiler_params=pltpu.CompilerParams(
            dimension_semantics=("parallel",),
            vmem_limit_bytes=_VMEM_LIMIT,
        ),
        cost_estimate=cost,
    )(x, w_taps)


# ---------------------------------------------------------------------------
# Kernel 2: fused  concat -> conv3x3(pad=1)+ReLU -> conv3x3(pad=1)+ReLU
# The concat is realized as two partial K-reductions (encoder half + decoder
# half of w_conv1).  The conv1 output stays in a VMEM scratch whose 1-pixel
# zero border supplies conv2's padding, so the middle activation never
# touches HBM.
#   xe_ref: (Ho+2, Wo+2, Ce)   encoder crop, spatially zero-padded by 1
#   xd_ref: (Ho+2, Wo+2, Cd)   upscaled decoder, spatially zero-padded by 1
#   w1e_ref: (9, Ce, Cm_p)  w1d_ref: (9, Cd, Cm_p)  w2_ref: (9, Cm_p, Co_p)
#   o_ref: (Ho, Wo, Co_p)      mid_ref: VMEM scratch (Ho+2, Wo+2, Cm_p) f32
# ---------------------------------------------------------------------------
def _decoder_tail_kernel(xe_ref, xd_ref, w1e_ref, w1d_ref, w2_ref, o_ref, mid_ref):
    Ho, Wo, Cop = o_ref.shape
    Cmp = mid_ref.shape[-1]

    # Re-zero the scratch every grid step (border = conv2 padding).  This keeps
    # the batch axis safely 'parallel' (scratch is per-core on v7x megacore).
    mid_ref[...] = jnp.zeros_like(mid_ref)

    def conv1_row(h, carry):
        acc = jnp.zeros((Wo, Cmp), jnp.float32)
        for i in range(3):
            for j in range(3):
                t = i * 3 + j
                ae = xe_ref[h + i, pl.ds(j, Wo), :].astype(jnp.bfloat16)
                ad = xd_ref[h + i, pl.ds(j, Wo), :].astype(jnp.bfloat16)
                acc = acc + jnp.dot(ae, w1e_ref[t], preferred_element_type=jnp.float32)
                acc = acc + jnp.dot(ad, w1d_ref[t], preferred_element_type=jnp.float32)
        mid_ref[h + 1, pl.ds(1, Wo), :] = jnp.maximum(acc, 0.0)
        return carry

    jax.lax.fori_loop(0, Ho, conv1_row, 0)

    def conv2_row(h, carry):
        acc = jnp.zeros((Wo, Cop), jnp.float32)
        for i in range(3):
            for j in range(3):
                t = i * 3 + j
                a = mid_ref[h + i, pl.ds(j, Wo), :].astype(jnp.bfloat16)
                acc = acc + jnp.dot(a, w2_ref[t], preferred_element_type=jnp.float32)
        o_ref[h] = jnp.maximum(acc, 0.0).astype(o_ref.dtype)
        return carry

    jax.lax.fori_loop(0, Ho, conv2_row, 0)


def fused_concat_double_conv(xe_pad, xd_pad, w1e, w1d, w2):
    N, Hp, Wp, Ce = xe_pad.shape
    Cd = xd_pad.shape[-1]
    Ho, Wo = Hp - 2, Wp - 2
    Cmp = w1e.shape[-1]
    Cop = w2.shape[-1]
    cost = pl.CostEstimate(
        flops=2 * N * Ho * Wo * 9 * ((Ce + Cd) * Cmp + Cmp * Cop),
        transcendentals=0,
        bytes_accessed=int(xe_pad.size * 4 + xd_pad.size * 4
                           + (w1e.size + w1d.size + w2.size) * 2
                           + N * Ho * Wo * Cop * 4),
    )
    return pl.pallas_call(
        _decoder_tail_kernel,
        out_shape=jax.ShapeDtypeStruct((N, Ho, Wo, Cop), jnp.float32),
        grid=(N,),
        in_specs=[
            pl.BlockSpec((None, Hp, Wp, Ce), lambda n: (n, 0, 0, 0)),
            pl.BlockSpec((None, Hp, Wp, Cd), lambda n: (n, 0, 0, 0)),
            pl.BlockSpec((9, Ce, Cmp), lambda n: (0, 0, 0)),
            pl.BlockSpec((9, Cd, Cmp), lambda n: (0, 0, 0)),
            pl.BlockSpec((9, Cmp, Cop), lambda n: (0, 0, 0)),
        ],
        out_specs=pl.BlockSpec((None, Ho, Wo, Cop), lambda n: (n, 0, 0, 0)),
        scratch_shapes=[pltpu.VMEM((Ho + 2, Wo + 2, Cmp), jnp.float32)],
        compiler_params=pltpu.CompilerParams(
            dimension_semantics=("parallel",),
            vmem_limit_bytes=_VMEM_LIMIT,
        ),
        cost_estimate=cost,
    )(xe_pad, xd_pad, w1e, w1d, w2)


# ---------------------------------------------------------------------------
# Layout / glue helpers (pure index math, stay in XLA)
# ---------------------------------------------------------------------------
def prep_conv_weight(w, cin_pad=None, cout_pad=None):
    """PyTorch OIHW (Cout, Cin, kh, kw) -> tap-major (kh*kw, Cin_p, Cout_p) bf16."""
    Cout, Cin, kh, kw = w.shape
    if cin_pad is None:
        cin_pad = Cin
    if cout_pad is None:
        cout_pad = _round_up(Cout, _LANE)
    wt = jnp.transpose(w, (2, 3, 1, 0)).reshape(kh * kw, Cin, Cout)
    wt = jnp.pad(wt, ((0, 0), (0, cin_pad - Cin), (0, cout_pad - Cout)))
    return wt.astype(jnp.bfloat16)


def bilinear_upsample_2x_nhwc(x):
    """Bilinear 2x upsample, align_corners=True, as two dense GEMMs (no gathers)."""
    N, H, W, C = x.shape

    def interp_matrix(n_in):
        n_out = 2 * n_in
        if n_in == 1:
            return jnp.ones((n_out, 1), jnp.float32)
        src = jnp.arange(n_out, dtype=jnp.float32) * (n_in - 1) / (n_out - 1)
        i0 = jnp.clip(jnp.floor(src).astype(jnp.int32), 0, n_in - 2)
        frac = src - i0.astype(jnp.float32)
        m0 = jax.nn.one_hot(i0, n_in, dtype=jnp.float32) * (1.0 - frac)[:, None]
        m1 = jax.nn.one_hot(i0 + 1, n_in, dtype=jnp.float32) * frac[:, None]
        return m0 + m1

    Uh = interp_matrix(H)
    Uw = interp_matrix(W)
    x = jnp.einsum('ph,nhwc->npwc', Uh, x)
    x = jnp.einsum('qw,npwc->npqc', Uw, x)
    return x


def center_crop_nhwc(x, th, tw):
    H, W = x.shape[1], x.shape[2]
    top = int(round((H - th) / 2.0))
    left = int(round((W - tw) / 2.0))
    return x[:, top:top + th, left:left + tw, :]


# ---------------------------------------------------------------------------
# DecoderBlock forward (mode='upsample', b_dropout=True -> eval-mode identity)
# ---------------------------------------------------------------------------
def decoder_block_forward(params, x_encoder, x_decoder):
    """NCHW in / NCHW out (PyTorch convention); NHWC + Pallas inside."""
    xe = jnp.transpose(x_encoder, (0, 2, 3, 1))   # -> NHWC once at the boundary
    xd = jnp.transpose(x_decoder, (0, 2, 3, 1))
    Ce = xe.shape[-1]

    # upscale: bilinear 2x (align_corners=True) then Conv2d(kernel=2, bias=False)
    # TODO(synk): the interpolation could additionally be folded into the same
    # Pallas kernel (per-row interp matrices) to drop the 2x HBM intermediate.
    up = bilinear_upsample_2x_nhwc(xd)
    w_up = prep_conv_weight(params["w_up"])                      # (4, Cin, 128)
    halved_pad = w_up.shape[-1]
    xdh = conv2d_nhwc(up, w_up, kh=2, kw=2, apply_relu=False)    # (N, h, w, 128)
    # Channels >= Cin//2 of xdh are exactly zero (zero-padded weights); feed the
    # lane-dense padded tensor straight to the fused tail (paired with zero
    # weights) instead of slicing it back to a narrow tensor.

    h, w = xdh.shape[1], xdh.shape[2]
    xe_crop = center_crop_nhwc(xe, h, w)

    # concat + DoubleConvolutionalLayer fused into a single Pallas kernel
    Cm = params["w_conv1"].shape[0]
    Co = params["w_conv2"].shape[0]
    Cmp = _round_up(Cm, _LANE)
    Cop = _round_up(Co, _LANE)
    w1e = prep_conv_weight(params["w_conv1"][:, :Ce], cout_pad=Cmp)
    w1d = prep_conv_weight(params["w_conv1"][:, Ce:], cin_pad=halved_pad, cout_pad=Cmp)
    w2 = prep_conv_weight(params["w_conv2"], cin_pad=Cmp, cout_pad=Cop)

    xe_p = jnp.pad(xe_crop, ((0, 0), (1, 1), (1, 1), (0, 0)))
    xd_p = jnp.pad(xdh, ((0, 0), (1, 1), (1, 1), (0, 0)))

    out = fused_concat_double_conv(xe_p, xd_p, w1e, w1d, w2)     # (N, h, w, Cop)
    out = out[..., :Co]

    # TODO(synk): Dropout2d(p=0.2) is stochastic in train mode; eval-mode identity here.
    return jnp.transpose(out, (0, 3, 1, 2))                      # back to NCHW


def init_params(key, input_channels, output_channels=None, middle_channels=None):
    if output_channels is None:
        output_channels = input_channels // 2
    if middle_channels is None:
        middle_channels = output_channels
    halved = input_channels // 2
    k1, k2, k3 = jax.random.split(key, 3)
    return {
        # nn.Conv2d(input_channels, halved, kernel_size=2, bias=False)
        "w_up": 0.1 * jax.random.normal(k1, (halved, input_channels, 2, 2), jnp.float32),
        # conv1: nn.Conv2d(input_channels, middle_channels, 3, padding=1, bias=False)
        "w_conv1": 0.1 * jax.random.normal(k2, (middle_channels, input_channels, 3, 3), jnp.float32),
        # conv2: nn.Conv2d(middle_channels, output_channels, 3, padding=1, bias=False)
        "w_conv2": 0.1 * jax.random.normal(k3, (output_channels, middle_channels, 3, 3), jnp.float32),
    }


if __name__ == "__main__":
    key = jax.random.PRNGKey(0)
    k_p, k_enc, k_dec = jax.random.split(key, 3)

    input_channels = 8                      # x_decoder channels
    params = init_params(k_p, input_channels)

    # x_decoder: (2, 8, 8, 8)  -> upsample (2,8,16,16) -> conv2x2 (2,4,15,15)
    # x_encoder: (2, 4, 19, 19) -> center-crop (2,4,15,15); concat -> conv3x3 x2
    x_decoder = jax.random.normal(k_dec, (2, input_channels, 8, 8), jnp.float32)
    x_encoder = jax.random.normal(k_enc, (2, input_channels // 2, 19, 19), jnp.float32)

    out = jax.jit(decoder_block_forward)(params, x_encoder, x_decoder)
    out = jax.block_until_ready(out)
    assert out.shape == (2, input_channels // 2, 15, 15), out.shape
    print("KERNEL_OK")
</pallas_src>

<mosaic_0001>
module attributes {stable_mosaic.version = 11 : i64} {
  func.func @_conv_nhwc_kernel(%arg0: i32, %arg1: memref<1x16x16x8xf32, #tpu.memory_space<vmem>>, %arg2: memref<4x8x128xbf16, #tpu.memory_space<vmem>>, %arg3: memref<1x15x15x128xf32, #tpu.memory_space<vmem>>) attributes {dimension_semantics = [#tpu.dimension_semantics<parallel>], iteration_bounds = array<i64: 2>, scalar_prefetch = 0 : i64, scratch_operands = 0 : i64, tpu.core_type = #tpu.core_type<tc>, window_params = [{transform_indices = @transform_0, window_bounds = array<i64: 1, 16, 16, 8>}, {pipeline_mode = #tpu.pipeline_mode<synchronous>, transform_indices = @transform_1, window_bounds = array<i64: 4, 8, 128>}, {transform_indices = @transform_2, window_bounds = array<i64: 1, 15, 15, 128>}]} {
    %c0_i32 = arith.constant 0 : i32
    %c15_i32 = arith.constant 15 : i32
    %0 = arith.addi %c0_i32, %c15_i32 : i32
    %c1_i32 = arith.constant 1 : i32
    scf.for %arg4 = %c0_i32 to %0 step %c1_i32  : i32 {
      %cst = arith.constant 0.000000e+00 : f32
      %1 = vector.broadcast %cst : f32 to vector<15x128xf32>
      %c0_i32_1 = arith.constant 0 : i32
      %2 = arith.addi %arg4, %c0_i32_1 : i32
      %c0 = arith.constant 0 : index
      %3 = arith.index_cast %2 : i32 to index
      %c0_2 = arith.constant 0 : index
      %c0_3 = arith.constant 0 : index
      %4 = vector.load %arg1[%c0, %3, %c0_2, %c0_3] : memref<1x16x16x8xf32, #tpu.memory_space<vmem>>, vector<1x1x15x8xf32>
      %5 = vector.shape_cast %4 : vector<1x1x15x8xf32> to vector<15x8xf32>
      %6 = arith.truncf %5 : vector<15x8xf32> to vector<15x8xbf16>
      %c0_4 = arith.constant 0 : index
      %c0_5 = arith.constant 0 : index
      %c0_6 = arith.constant 0 : index
      %7 = vector.load %arg2[%c0_4, %c0_5, %c0_6] : memref<4x8x128xbf16, #tpu.memory_space<vmem>>, vector<1x8x128xbf16>
      %8 = vector.shape_cast %7 : vector<1x8x128xbf16> to vector<8x128xbf16>
      %cst_7 = arith.constant dense<0.000000e+00> : vector<15x128xf32>
      %9 = tpu.matmul %6, %8, %cst_7 {dimension_numbers = #tpu.dot_dimension_numbers<[1], [0], [0], [1], [0, 0, 1, 1], [], []>} : vector<15x8xbf16>, vector<8x128xbf16>, vector<15x128xf32> -> vector<15x128xf32>
      %10 = arith.addf %1, %9 : vector<15x128xf32>
      %c0_i32_8 = arith.constant 0 : i32
      %11 = arith.addi %arg4, %c0_i32_8 : i32
      %c0_9 = arith.constant 0 : index
      %12 = arith.index_cast %11 : i32 to index
      %c1 = arith.constant 1 : index
      %c0_10 = arith.constant 0 : index
      %13 = vector.load %arg1[%c0_9, %12, %c1, %c0_10] : memref<1x16x16x8xf32, #tpu.memory_space<vmem>>, vector<1x1x15x8xf32>
      %14 = vector.shape_cast %13 : vector<1x1x15x8xf32> to vector<15x8xf32>
      %15 = arith.truncf %14 : vector<15x8xf32> to vector<15x8xbf16>
      %c1_11 = arith.constant 1 : index
      %c0_12 = arith.constant 0 : index
      %c0_13 = arith.constant 0 : index
      %16 = vector.load %arg2[%c1_11, %c0_12, %c0_13] : memref<4x8x128xbf16, #tpu.memory_space<vmem>>, vector<1x8x128xbf16>
      %17 = vector.shape_cast %16 : vector<1x8x128xbf16> to vector<8x128xbf16>
      %cst_14 = arith.constant dense<0.000000e+00> : vector<15x128xf32>
      %18 = tpu.matmul %15, %17, %cst_14 {dimension_numbers = #tpu.dot_dimension_numbers<[1], [0], [0], [1], [0, 0, 1, 1], [], []>} : vector<15x8xbf16>, vector<8x128xbf16>, vector<15x128xf32> -> vector<15x128xf32>
      %19 = arith.addf %10, %18 : vector<15x128xf32>
      %c1_i32_15 = arith.constant 1 : i32
      %20 = arith.addi %arg4, %c1_i32_15 : i32
      %c0_16 = arith.constant 0 : index
      %21 = arith.index_cast %20 : i32 to index
      %c0_17 = arith.constant 0 : index
      %c0_18 = arith.constant 0 : index
      %22 = vector.load %arg1[%c0_16, %21, %c0_17, %c0_18] : memref<1x16x16x8xf32, #tpu.memory_space<vmem>>, vector<1x1x15x8xf32>
      %23 = vector.shape_cast %22 : vector<1x1x15x8xf32> to vector<15x8xf32>
      %24 = arith.truncf %23 : vector<15x8xf32> to vector<15x8xbf16>
      %c2 = arith.constant 2 : index
      %c0_19 = arith.constant 0 : index
      %c0_20 = arith.constant 0 : index
      %25 = vector.load %arg2[%c2, %c0_19, %c0_20] : memref<4x8x128xbf16, #tpu.memory_space<vmem>>, vector<1x8x128xbf16>
      %26 = vector.shape_cast %25 : vector<1x8x128xbf16> to vector<8x128xbf16>
      %cst_21 = arith.constant dense<0.000000e+00> : vector<15x128xf32>
      %27 = tpu.matmul %24, %26, %cst_21 {dimension_numbers = #tpu.dot_dimension_numbers<[1], [0], [0], [1], [0, 0, 1, 1], [], []>} : vector<15x8xbf16>, vector<8x128xbf16>, vector<15x128xf32> -> vector<15x128xf32>
      %28 = arith.addf %19, %27 : vector<15x128xf32>
      %c1_i32_22 = arith.constant 1 : i32
      %29 = arith.addi %arg4, %c1_i32_22 : i32
      %c0_23 = arith.constant 0 : index
      %30 = arith.index_cast %29 : i32 to index
      %c1_24 = arith.constant 1 : index
      %c0_25 = arith.constant 0 : index
      %31 = vector.load %arg1[%c0_23, %30, %c1_24, %c0_25] : memref<1x16x16x8xf32, #tpu.memory_space<vmem>>, vector<1x1x15x8xf32>
      %32 = vector.shape_cast %31 : vector<1x1x15x8xf32> to vector<15x8xf32>
      %33 = arith.truncf %32 : vector<15x8xf32> to vector<15x8xbf16>
      %c3 = arith.constant 3 : index
      %c0_26 = arith.constant 0 : index
      %c0_27 = arith.constant 0 : index
      %34 = vector.load %arg2[%c3, %c0_26, %c0_27] : memref<4x8x128xbf16, #tpu.memory_space<vmem>>, vector<1x8x128xbf16>
      %35 = vector.shape_cast %34 : vector<1x8x128xbf16> to vector<8x128xbf16>
      %cst_28 = arith.constant dense<0.000000e+00> : vector<15x128xf32>
      %36 = tpu.matmul %33, %35, %cst_28 {dimension_numbers = #tpu.dot_dimension_numbers<[1], [0], [0], [1], [0, 0, 1, 1], [], []>} : vector<15x8xbf16>, vector<8x128xbf16>, vector<15x128xf32> -> vector<15x128xf32>
      %37 = arith.addf %28, %36 : vector<15x128xf32>
      %c0_29 = arith.constant 0 : index
      %38 = arith.index_cast %arg4 : i32 to index
      %c0_30 = arith.constant 0 : index
      %c0_31 = arith.constant 0 : index
      %39 = vector.load %arg3[%c0_29, %38, %c0_30, %c0_31] : memref<1x15x15x128xf32, #tpu.memory_space<vmem>>, vector<1x1x15x128xf32>
      %40 = vector.shape_cast %39 : vector<1x1x15x128xf32> to vector<15x128xf32>
      %41 = vector.shape_cast %37 : vector<15x128xf32> to vector<1x1x15x128xf32>
      tpu.vector_store %arg3[%c0_29, %38, %c0_30, %c0_31], %41 {strides = array<i32>} : memref<1x15x15x128xf32, #tpu.memory_space<vmem>>, vector<1x1x15x128xf32>,
    }
    %c15_i32_0 = arith.constant 15 : i32
    return
  }
  func.func @transform_0(%arg0: i32) -> (i32, i32, i32, i32) {
    %c0_i32 = arith.constant 0 : i32
    %c0_i32_0 = arith.constant 0 : i32
    %c0_i32_1 = arith.constant 0 : i32
    %c0_i32_2 = arith.constant 0 : i32
    return %arg0, %c0_i32, %c0_i32_0, %c0_i32_1 : i32, i32, i32, i32
  }
  func.func @transform_1(%arg0: i32) -> (i32, i32, i32) {
    %c0_i32 = arith.constant 0 : i32
    %c0_i32_0 = arith.constant 0 : i32
    %c0_i32_1 = arith.constant 0 : i32
    %c0_i32_2 = arith.constant 0 : i32
    return %c0_i32, %c0_i32_0, %c0_i32_1 : i32, i32, i32
  }
  func.func @transform_2(%arg0: i32) -> (i32, i32, i32, i32) {
    %c0_i32 = arith.constant 0 : i32
    %c0_i32_0 = arith.constant 0 : i32
    %c0_i32_1 = arith.constant 0 : i32
    %c0_i32_2 = arith.constant 0 : i32
    return %arg0, %c0_i32, %c0_i32_0, %c0_i32_1 : i32, i32, i32, i32
  }
}

module attributes {stable_mosaic.version = 11 : i64} {
  func.func @_decoder_tail_kernel(%arg0: i32, %arg1: memref<1x17x17x4xf32, #tpu.memory_space<vmem>>, %arg2: memref<1x17x17x128xf32, #tpu.memory_space<vmem>>, %arg3: memref<9x4x128xbf16, #tpu.memory_space<vmem>>, %arg4: memref<9x128x128xbf16, #tpu.memory_space<vmem>>, %arg5: memref<9x128x128xbf16, #tpu.memory_space<vmem>>, %arg6: memref<1x15x15x128xf32, #tpu.memory_space<vmem>>, %arg7: memref<17x17x128xf32, #tpu.memory_space<vmem>>) attributes {dimension_semantics = [#tpu.dimension_semantics<parallel>], iteration_bounds = array<i64: 2>, scalar_prefetch = 0 : i64, scratch_operands = 1 : i64, tpu.core_type = #tpu.core_type<tc>, window_params = [{transform_indices = @transform_0, window_bounds = array<i64: 1, 17, 17, 4>}, {transform_indices = @transform_1, window_bounds = array<i64: 1, 17, 17, 128>}, {pipeline_mode = #tpu.pipeline_mode<synchronous>, transform_indices = @transform_2, window_bounds = array<i64: 9, 4, 128>}, {pipeline_mode = #tpu.pipeline_mode<synchronous>, transform_indices = @transform_3, window_bounds = array<i64: 9, 128, 128>}, {pipeline_mode = #tpu.pipeline_mode<synchronous>, transform_indices = @transform_4, window_bounds = array<i64: 9, 128, 128>}, {transform_indices = @transform_5, window_bounds = array<i64: 1, 15, 15, 128>}]} {
    %cst = arith.constant 0.000000e+00 : f32
    %0 = vector.broadcast %cst : f32 to vector<17x17x128xf32>
    %c0 = arith.constant 0 : index
    %c0_0 = arith.constant 0 : index
    %c0_1 = arith.constant 0 : index
    %1 = vector.load %arg7[%c0, %c0_0, %c0_1] : memref<17x17x128xf32, #tpu.memory_space<vmem>>, vector<17x17x128xf32>
    tpu.vector_store %arg7[%c0, %c0_0, %c0_1], %0 {strides = array<i32>} : memref<17x17x128xf32, #tpu.memory_space<vmem>>, vector<17x17x128xf32>,
    %c0_i32 = arith.constant 0 : i32
    %c15_i32 = arith.constant 15 : i32
    %2 = arith.addi %c0_i32, %c15_i32 : i32
    %c1_i32 = arith.constant 1 : i32
    scf.for %arg8 = %c0_i32 to %2 step %c1_i32  : i32 {
      %cst_7 = arith.constant 0.000000e+00 : f32
      %4 = vector.broadcast %cst_7 : f32 to vector<15x128xf32>
      %c0_i32_8 = arith.constant 0 : i32
      %5 = arith.addi %arg8, %c0_i32_8 : i32
      %c0_9 = arith.constant 0 : index
      %6 = arith.index_cast %5 : i32 to index
      %c0_10 = arith.constant 0 : index
      %c0_11 = arith.constant 0 : index
      %7 = vector.load %arg1[%c0_9, %6, %c0_10, %c0_11] : memref<1x17x17x4xf32, #tpu.memory_space<vmem>>, vector<1x1x15x4xf32>
      %8 = vector.shape_cast %7 : vector<1x1x15x4xf32> to vector<15x4xf32>
      %9 = arith.truncf %8 : vector<15x4xf32> to vector<15x4xbf16>
      %c0_i32_12 = arith.constant 0 : i32
      %10 = arith.addi %arg8, %c0_i32_12 : i32
      %c0_13 = arith.constant 0 : index
      %11 = arith.index_cast %10 : i32 to index
      %c0_14 = arith.constant 0 : index
      %c0_15 = arith.constant 0 : index
      %12 = vector.load %arg2[%c0_13, %11, %c0_14, %c0_15] : memref<1x17x17x128xf32, #tpu.memory_space<vmem>>, vector<1x1x15x128xf32>
      %13 = vector.shape_cast %12 : vector<1x1x15x128xf32> to vector<15x128xf32>
      %14 = arith.truncf %13 : vector<15x128xf32> to vector<15x128xbf16>
      %c0_16 = arith.constant 0 : index
      %c0_17 = arith.constant 0 : index
      %c0_18 = arith.constant 0 : index
      %15 = vector.load %arg3[%c0_16, %c0_17, %c0_18] : memref<9x4x128xbf16, #tpu.memory_space<vmem>>, vector<1x4x128xbf16>
      %16 = vector.shape_cast %15 : vector<1x4x128xbf16> to vector<4x128xbf16>
      %cst_19 = arith.constant dense<0.000000e+00> : vector<15x128xf32>
      %17 = tpu.matmul %9, %16, %cst_19 {dimension_numbers = #tpu.dot_dimension_numbers<[1], [0], [0], [1], [0, 0, 1, 1], [], []>} : vector<15x4xbf16>, vector<4x128xbf16>, vector<15x128xf32> -> vector<15x128xf32>
      %18 = arith.addf %4, %17 : vector<15x128xf32>
      %c0_20 = arith.constant 0 : index
      %c0_21 = arith.constant 0 : index
      %c0_22 = arith.constant 0 : index
      %19 = vector.load %arg4[%c0_20, %c0_21, %c0_22] : memref<9x128x128xbf16, #tpu.memory_space<vmem>>, vector<1x128x128xbf16>
      %20 = vector.shape_cast %19 : vector<1x128x128xbf16> to vector<128x128xbf16>
      %cst_23 = arith.constant dense<0.000000e+00> : vector<15x128xf32>
      %21 = tpu.matmul %14, %20, %cst_23 {dimension_numbers = #tpu.dot_dimension_numbers<[1], [0], [0], [1], [0, 0, 1, 1], [], []>} : vector<15x128xbf16>, vector<128x128xbf16>, vector<15x128xf32> -> vector<15x128xf32>
      %22 = arith.addf %18, %21 : vector<15x128xf32>
      %c0_i32_24 = arith.constant 0 : i32
      %23 = arith.addi %arg8, %c0_i32_24 : i32
      %c0_25 = arith.constant 0 : index
      %24 = arith.index_cast %23 : i32 to index
      %c1 = arith.constant 1 : index
      %c0_26 = arith.constant 0 : index
      %25 = vector.load %arg1[%c0_25, %24, %c1, %c0_26] : memref<1x17x17x4xf32, #tpu.memory_space<vmem>>, vector<1x1x15x4xf32>
      %26 = vector.shape_cast %25 : vector<1x1x15x4xf32> to vector<15x4xf32>
      %27 = arith.truncf %26 : vector<15x4xf32> to vector<15x4xbf16>
      %c0_i32_27 = arith.constant 0 : i32
      %28 = arith.addi %arg8, %c0_i32_27 : i32
      %c0_28 = arith.constant 0 : index
      %29 = arith.index_cast %28 : i32 to index
      %c1_29 = arith.constant 1 : index
      %c0_30 = arith.constant 0 : index
      %30 = vector.load %arg2[%c0_28, %29, %c1_29, %c0_30] : memref<1x17x17x128xf32, #tpu.memory_space<vmem>>, vector<1x1x15x128xf32>
      %31 = vector.shape_cast %30 : vector<1x1x15x128xf32> to vector<15x128xf32>
      %32 = arith.truncf %31 : vector<15x128xf32> to vector<15x128xbf16>
      %c1_31 = arith.constant 1 : index
      %c0_32 = arith.constant 0 : index
      %c0_33 = arith.constant 0 : index
      %33 = vector.load %arg3[%c1_31, %c0_32, %c0_33] : memref<9x4x128xbf16, #tpu.memory_space<vmem>>, vector<1x4x128xbf16>
      %34 = vector.shape_cast %33 : vector<1x4x128xbf16> to vector<4x128xbf16>
      %cst_34 = arith.constant dense<0.000000e+00> : vector<15x128xf32>
      %35 = tpu.matmul %27, %34, %cst_34 {dimension_numbers = #tpu.dot_dimension_numbers<[1], [0], [0], [1], [0, 0, 1, 1], [], []>} : vector<15x4xbf16>, vector<4x128xbf16>, vector<15x128xf32> -> vector<15x128xf32>
      %36 = arith.addf %22, %35 : vector<15x128xf32>
      %c1_35 = arith.constant 1 : index
      %c0_36 = arith.constant 0 : index
      %c0_37 = arith.constant 0 : index
      %37 = vector.load %arg4[%c1_35, %c0_36, %c0_37] : memref<9x128x128xbf16, #tpu.memory_space<vmem>>, vector<1x128x128xbf16>
      %38 = vector.shape_cast %37 : vector<1x128x128xbf16> to vector<128x128xbf16>
      %cst_38 = arith.constant dense<0.000000e+00> : vector<15x128xf32>
      %39 = tpu.matmul %32, %38, %cst_38 {dimension_numbers = #tpu.dot_dimension_numbers<[1], [0], [0], [1], [0, 0, 1, 1], [], []>} : vector<15x128xbf16>, vector<128x128xbf16>, vector<15x128xf32> -> vector<15x128xf32>
      %40 = arith.addf %36, %39 : vector<15x128xf32>
      %c0_i32_39 = arith.constant 0 : i32
      %41 = arith.addi %arg8, %c0_i32_39 : i32
      %c0_40 = arith.constant 0 : index
      %42 = arith.index_cast %41 : i32 to index
      %c2 = arith.constant 2 : index
      %c0_41 = arith.constant 0 : index
      %43 = vector.load %arg1[%c0_40, %42, %c2, %c0_41] : memref<1x17x17x4xf32, #tpu.memory_space<vmem>>, vector<1x1x15x4xf32>
      %44 = vector.shape_cast %43 : vector<1x1x15x4xf32> to vector<15x4xf32>
      %45 = arith.truncf %44 : vector<15x4xf32> to vector<15x4xbf16>
      %c0_i32_42 = arith.constant 0 : i32
      %46 = arith.addi %arg8, %c0_i32_42 : i32
      %c0_43 = arith.constant 0 : index
      %47 = arith.index_cast %46 : i32 to index
      %c2_44 = arith.constant 2 : index
      %c0_45 = arith.constant 0 : index
      %48 = vector.load %arg2[%c0_43, %47, %c2_44, %c0_45] : memref<1x17x17x128xf32, #tpu.memory_space<vmem>>, vector<1x1x15x128xf32>
      %49 = vector.shape_cast %48 : vector<1x1x15x128xf32> to vector<15x128xf32>
      %50 = arith.truncf %49 : vector<15x128xf32> to vector<15x128xbf16>
      %c2_46 = arith.constant 2 : index
      %c0_47 = arith.constant 0 : index
      %c0_48 = arith.constant 0 : index
      %51 = vector.load %arg3[%c2_46, %c0_47, %c0_48] : memref<9x4x128xbf16, #tpu.memory_space<vmem>>, vector<1x4x128xbf16>
      %52 = vector.shape_cast %51 : vector<1x4x128xbf16> to vector<4x128xbf16>
      %cst_49 = arith.constant dense<0.000000e+00> : vector<15x128xf32>
      %53 = tpu.matmul %45, %52, %cst_49 {dimension_numbers = #tpu.dot_dimension_numbers<[1], [0], [0], [1], [0, 0, 1, 1], [], []>} : vector<15x4xbf16>, vector<4x128xbf16>, vector<15x128xf32> -> vector<15x128xf32>
      %54 = arith.addf %40, %53 : vector<15x128xf32>
      %c2_50 = arith.constant 2 : index
      %c0_51 = arith.constant 0 : index
      %c0_52 = arith.constant 0 : index
      %55 = vector.load %arg4[%c2_50, %c0_51, %c0_52] : memref<9x128x128xbf16, #tpu.memory_space<vmem>>, vector<1x128x128xbf16>
      %56 = vector.shape_cast %55 : vector<1x128x128xbf16> to vector<128x128xbf16>
      %cst_53 = arith.constant dense<0.000000e+00> : vector<15x128xf32>
      %57 = tpu.matmul %50, %56, %cst_53 {dimension_numbers = #tpu.dot_dimension_numbers<[1], [0], [0], [1], [0, 0, 1, 1], [], []>} : vector<15x128xbf16>, vector<128x128xbf16>, vector<15x128xf32> -> vector<15x128xf32>
      %58 = arith.addf %54, %57 : vector<15x128xf32>
      %c1_i32_54 = arith.constant 1 : i32
      %59 = arith.addi %arg8, %c1_i32_54 : i32
      %c0_55 = arith.constant 0 : index
      %60 = arith.index_cast %59 : i32 to index
      %c0_56 = arith.constant 0 : index
      %c0_57 = arith.constant 0 : index
      %61 = vector.load %arg1[%c0_55, %60, %c0_56, %c0_57] : memref<1x17x17x4xf32, #tpu.memory_space<vmem>>, vector<1x1x15x4xf32>
      %62 = vector.shape_cast %61 : vector<1x1x15x4xf32> to vector<15x4xf32>
      %63 = arith.truncf %62 : vector<15x4xf32> to vector<15x4xbf16>
      %c1_i32_58 = arith.constant 1 : i32
      %64 = arith.addi %arg8, %c1_i32_58 : i32
      %c0_59 = arith.constant 0 : index
      %65 = arith.index_cast %64 : i32 to index
      %c0_60 = arith.constant 0 : index
      %c0_61 = arith.constant 0 : index
      %66 = vector.load %arg2[%c0_59, %65, %c0_60, %c0_61] : memref<1x17x17x128xf32, #tpu.memory_space<vmem>>, vector<1x1x15x128xf32>
      %67 = vector.shape_cast %66 : vector<1x1x15x128xf32> to vector<15x128xf32>
      %68 = arith.truncf %67 : vector<15x128xf32> to vector<15x128xbf16>
      %c3 = arith.constant 3 : index
      %c0_62 = arith.constant 0 : index
      %c0_63 = arith.constant 0 : index
      %69 = vector.load %arg3[%c3, %c0_62, %c0_63] : memref<9x4x128xbf16, #tpu.memory_space<vmem>>, vector<1x4x128xbf16>
      %70 = vector.shape_cast %69 : vector<1x4x128xbf16> to vector<4x128xbf16>
      %cst_64 = arith.constant dense<0.000000e+00> : vector<15x128xf32>
      %71 = tpu.matmul %63, %70, %cst_64 {dimension_numbers = #tpu.dot_dimension_numbers<[1], [0], [0], [1], [0, 0, 1, 1], [], []>} : vector<15x4xbf16>, vector<4x128xbf16>, vector<15x128xf32> -> vector<15x128xf32>
      %72 = arith.addf %58, %71 : vector<15x128xf32>
      %c3_65 = arith.constant 3 : index
      %c0_66 = arith.constant 0 : index
      %c0_67 = arith.constant 0 : index
      %73 = vector.load %arg4[%c3_65, %c0_66, %c0_67] : memref<9x128x128xbf16, #tpu.memory_space<vmem>>, vector<1x128x128xbf16>
      %74 = vector.shape_cast %73 : vector<1x128x128xbf16> to vector<128x128xbf16>
      %cst_68 = arith.constant dense<0.000000e+00> : vector<15x128xf32>
      %75 = tpu.matmul %68, %74, %cst_68 {dimension_numbers = #tpu.dot_dimension_numbers<[1], [0], [0], [1], [0, 0, 1, 1], [], []>} : vector<15x128xbf16>, vector<128x128xbf16>, vector<15x128xf32> -> vector<15x128xf32>
      %76 = arith.addf %72, %75 : vector<15x128xf32>
      %c1_i32_69 = arith.constant 1 : i32
      %77 = arith.addi %arg8, %c1_i32_69 : i32
      %c0_70 = arith.constant 0 : index
      %78 = arith.index_cast %77 : i32 to index
      %c1_71 = arith.constant 1 : index
      %c0_72 = arith.constant 0 : index
      %79 = vector.load %arg1[%c0_70, %78, %c1_71, %c0_72] : memref<1x17x17x4xf32, #tpu.memory_space<vmem>>, vector<1x1x15x4xf32>
      %80 = vector.shape_cast %79 : vector<1x1x15x4xf32> to vector<15x4xf32>
      %81 = arith.truncf %80 : vector<15x4xf32> to vector<15x4xbf16>
      %c1_i32_73 = arith.constant 1 : i32
      %82 = arith.addi %arg8, %c1_i32_73 : i32
      %c0_74 = arith.constant 0 : index
      %83 = arith.index_cast %82 : i32 to index
      %c1_75 = arith.constant 1 : index
      %c0_76 = arith.constant 0 : index
      %84 = vector.load %arg2[%c0_74, %83, %c1_75, %c0_76] : memref<1x17x17x128xf32, #tpu.memory_space<vmem>>, vector<1x1x15x128xf32>
      %85 = vector.shape_cast %84 : vector<1x1x15x128xf32> to vector<15x128xf32>
      %86 = arith.truncf %85 : vector<15x128xf32> to vector<15x128xbf16>
      %c4 = arith.constant 4 : index
      %c0_77 = arith.constant 0 : index
      %c0_78 = arith.constant 0 : index
      %87 = vector.load %arg3[%c4, %c0_77, %c0_78] : memref<9x4x128xbf16, #tpu.memory_space<vmem>>, vector<1x4x128xbf16>
      %88 = vector.shape_cast %87 : vector<1x4x128xbf16> to vector<4x128xbf16>
      %cst_79 = arith.constant dense<0.000000e+00> : vector<15x128xf32>
      %89 = tpu.matmul %81, %88, %cst_79 {dimension_numbers = #tpu.dot_dimension_numbers<[1], [0], [0], [1], [0, 0, 1, 1], [], []>} : vector<15x4xbf16>, vector<4x128xbf16>, vector<15x128xf32> -> vector<15x128xf32>
      %90 = arith.addf %76, %89 : vector<15x128xf32>
      %c4_80 = arith.constant 4 : index
      %c0_81 = arith.constant 0 : index
      %c0_82 = arith.constant 0 : index
      %91 = vector.load %arg4[%c4_80, %c0_81, %c0_82] : memref<9x128x128xbf16, #tpu.memory_space<vmem>>, vector<1x128x128xbf16>
      %92 = vector.shape_cast %91 : vector<1x128x128xbf16> to vector<128x128xbf16>
      %cst_83 = arith.constant dense<0.000000e+00> : vector<15x128xf32>
      %93 = tpu.matmul %86, %92, %cst_83 {dimension_numbers = #tpu.dot_dimension_numbers<[1], [0], [0], [1], [0, 0, 1, 1], [], []>} : vector<15x128xbf16>, vector<128x128xbf16>, vector<15x128xf32> -> vector<15x128xf32>
      %94 = arith.addf %90, %93 : vector<15x128xf32>
      %c1_i32_84 = arith.constant 1 : i32
      %95 = arith.addi %arg8, %c1_i32_84 : i32
      %c0_85 = arith.constant 0 : index
      %96 = arith.index_cast %95 : i32 to index
      %c2_86 = arith.constant 2 : index
      %c0_87 = arith.constant 0 : index
      %97 = vector.load %arg1[%c0_85, %96, %c2_86, %c0_87] : memref<1x17x17x4xf32, #tpu.memory_space<vmem>>, vector<1x1x15x4xf32>
      %98 = vector.shape_cast %97 : vector<1x1x15x4xf32> to vector<15x4xf32>
      %99 = arith.truncf %98 : vector<15x4xf32> to vector<15x4xbf16>
      %c1_i32_88 = arith.constant 1 : i32
      %100 = arith.addi %arg8, %c1_i32_88 : i32
      %c0_89 = arith.constant 0 : index
      %101 = arith.index_cast %100 : i32 to index
      %c2_90 = arith.constant 2 : index
      %c0_91 = arith.constant 0 : index
      %102 = vector.load %arg2[%c0_89, %101, %c2_90, %c0_91] : memref<1x17x17x128xf32, #tpu.memory_space<vmem>>, vector<1x1x15x128xf32>
      %103 = vector.shape_cast %102 : vector<1x1x15x128xf32> to vector<15x128xf32>
      %104 = arith.truncf %103 : vector<15x128xf32> to vector<15x128xbf16>
      %c5 = arith.constant 5 : index
      %c0_92 = arith.constant 0 : index
      %c0_93 = arith.constant 0 : index
      %105 = vector.load %arg3[%c5, %c0_92, %c0_93] : memref<9x4x128xbf16, #tpu.memory_space<vmem>>, vector<1x4x128xbf16>
      %106 = vector.shape_cast %105 : vector<1x4x128xbf16> to vector<4x128xbf16>
      %cst_94 = arith.constant dense<0.000000e+00> : vector<15x128xf32>
      %107 = tpu.matmul %99, %106, %cst_94 {dimension_numbers = #tpu.dot_dimension_numbers<[1], [0], [0], [1], [0, 0, 1, 1], [], []>} : vector<15x4xbf16>, vector<4x128xbf16>, vector<15x128xf32> -> vector<15x128xf32>
      %108 = arith.addf %94, %107 : vector<15x128xf32>
      %c5_95 = arith.constant 5 : index
      %c0_96 = arith.constant 0 : index
      %c0_97 = arith.constant 0 : index
      %109 = vector.load %arg4[%c5_95, %c0_96, %c0_97] : memref<9x128x128xbf16, #tpu.memory_space<vmem>>, vector<1x128x128xbf16>
      %110 = vector.shape_cast %109 : vector<1x128x128xbf16> to vector<128x128xbf16>
      %cst_98 = arith.constant dense<0.000000e+00> : vector<15x128xf32>
      %111 = tpu.matmul %104, %110, %cst_98 {dimension_numbers = #tpu.dot_dimension_numbers<[1], [0], [0], [1], [0, 0, 1, 1], [], []>} : vector<15x128xbf16>, vector<128x128xbf16>, vector<15x128xf32> -> vector<15x128xf32>
      %112 = arith.addf %108, %111 : vector<15x128xf32>
      %c2_i32 = arith.constant 2 : i32
      %113 = arith.addi %arg8, %c2_i32 : i32
      %c0_99 = arith.constant 0 : index
      %114 = arith.index_cast %113 : i32 to index
      %c0_100 = arith.constant 0 : index
      %c0_101 = arith.constant 0 : index
      %115 = vector.load %arg1[%c0_99, %114, %c0_100, %c0_101] : memref<1x17x17x4xf32, #tpu.memory_space<vmem>>, vector<1x1x15x4xf32>
      %116 = vector.shape_cast %115 : vector<1x1x15x4xf32> to vector<15x4xf32>
      %117 = arith.truncf %116 : vector<15x4xf32> to vector<15x4xbf16>
      %c2_i32_102 = arith.constant 2 : i32
      %118 = arith.addi %arg8, %c2_i32_102 : i32
      %c0_103 = arith.constant 0 : index
      %119 = arith.index_cast %118 : i32 to index
      %c0_104 = arith.constant 0 : index
      %c0_105 = arith.constant 0 : index
      %120 = vector.load %arg2[%c0_103, %119, %c0_104, %c0_105] : memref<1x17x17x128xf32, #tpu.memory_space<vmem>>, vector<1x1x15x128xf32>
      %121 = vector.shape_cast %120 : vector<1x1x15x128xf32> to vector<15x128xf32>
      %122 = arith.truncf %121 : vector<15x128xf32> to vector<15x128xbf16>
      %c6 = arith.constant 6 : index
      %c0_106 = arith.constant 0 : index
      %c0_107 = arith.constant 0 : index
      %123 = vector.load %arg3[%c6, %c0_106, %c0_107] : memref<9x4x128xbf16, #tpu.memory_space<vmem>>, vector<1x4x128xbf16>
      %124 = vector.shape_cast %123 : vector<1x4x128xbf16> to vector<4x128xbf16>
      %cst_108 = arith.constant dense<0.000000e+00> : vector<15x128xf32>
      %125 = tpu.matmul %117, %124, %cst_108 {dimension_numbers = #tpu.dot_dimension_numbers<[1], [0], [0], [1], [0, 0, 1, 1], [], []>} : vector<15x4xbf16>, vector<4x128xbf16>, vector<15x128xf32> -> vector<15x128xf32>
      %126 = arith.addf %112, %125 : vector<15x128xf32>
      %c6_109 = arith.constant 6 : index
      %c0_110 = arith.constant 0 : index
      %c0_111 = arith.constant 0 : index
      %127 = vector.load %arg4[%c6_109, %c0_110, %c0_111] : memref<9x128x128xbf16, #tpu.memory_space<vmem>>, vector<1x128x128xbf16>
      %128 = vector.shape_cast %127 : vector<1x128x128xbf16> to vector<128x128xbf16>
      %cst_112 = arith.constant dense<0.000000e+00> : vector<15x128xf32>
      %129 = tpu.matmul %122, %128, %cst_112 {dimension_numbers = #tpu.dot_dimension_numbers<[1], [0], [0], [1], [0, 0, 1, 1], [], []>} : vector<15x128xbf16>, vector<128x128xbf16>, vector<15x128xf32> -> vector<15x128xf32>
      %130 = arith.addf %126, %129 : vector<15x128xf32>
      %c2_i32_113 = arith.constant 2 : i32
      %131 = arith.addi %arg8, %c2_i32_113 : i32
      %c0_114 = arith.constant 0 : index
      %132 = arith.index_cast %131 : i32 to index
      %c1_115 = arith.constant 1 : index
      %c0_116 = arith.constant 0 : index
      %133 = vector.load %arg1[%c0_114, %132, %c1_115, %c0_116] : memref<1x17x17x4xf32, #tpu.memory_space<vmem>>, vector<1x1x15x4xf32>
      %134 = vector.shape_cast %133 : vector<1x1x15x4xf32> to vector<15x4xf32>
      %135 = arith.truncf %134 : vector<15x4xf32> to vector<15x4xbf16>
      %c2_i32_117 = arith.constant 2 : i32
      %136 = arith.addi %arg8, %c2_i32_117 : i32
      %c0_118 = arith.constant 0 : index
      %137 = arith.index_cast %136 : i32 to index
      %c1_119 = arith.constant 1 : index
      %c0_120 = arith.constant 0 : index
      %138 = vector.load %arg2[%c0_118, %137, %c1_119, %c0_120] : memref<1x17x17x128xf32, #tpu.memory_space<vmem>>, vector<1x1x15x128xf32>
      %139 = vector.shape_cast %138 : vector<1x1x15x128xf32> to vector<15x128xf32>
      %140 = arith.truncf %139 : vector<15x128xf32> to vector<15x128xbf16>
      %c7 = arith.constant 7 : index
      %c0_121 = arith.constant 0 : index
      %c0_122 = arith.constant 0 : index
      %141 = vector.load %arg3[%c7, %c0_121, %c0_122] : memref<9x4x128xbf16, #tpu.memory_space<vmem>>, vector<1x4x128xbf16>
      %142 = vector.shape_cast %141 : vector<1x4x128xbf16> to vector<4x128xbf16>
      %cst_123 = arith.constant dense<0.000000e+00> : vector<15x128xf32>
      %143 = tpu.matmul %135, %142, %cst_123 {dimension_numbers = #tpu.dot_dimension_numbers<[1], [0], [0], [1], [0, 0, 1, 1], [], []>} : vector<15x4xbf16>, vector<4x128xbf16>, vector<15x128xf32> -> vector<15x128xf32>
      %144 = arith.addf %130, %143 : vector<15x128xf32>
      %c7_124 = arith.constant 7 : index
      %c0_125 = arith.constant 0 : index
      %c0_126 = arith.constant 0 : index
      %145 = vector.load %arg4[%c7_124, %c0_125, %c0_126] : memref<9x128x128xbf16, #tpu.memory_space<vmem>>, vector<1x128x128xbf16>
      %146 = vector.shape_cast %145 : vector<1x128x128xbf16> to vector<128x128xbf16>
      %cst_127 = arith.constant dense<0.000000e+00> : vector<15x128xf32>
      %147 = tpu.matmul %140, %146, %cst_127 {dimension_numbers = #tpu.dot_dimension_numbers<[1], [0], [0], [1], [0, 0, 1, 1], [], []>} : vector<15x128xbf16>, vector<128x128xbf16>, vector<15x128xf32> -> vector<15x128xf32>
      %148 = arith.addf %144, %147 : vector<15x128xf32>
      %c2_i32_128 = arith.constant 2 : i32
      %149 = arith.addi %arg8, %c2_i32_128 : i32
      %c0_129 = arith.constant 0 : index
      %150 = arith.index_cast %149 : i32 to index
      %c2_130 = arith.constant 2 : index
      %c0_131 = arith.constant 0 : index
      %151 = vector.load %arg1[%c0_129, %150, %c2_130, %c0_131] : memref<1x17x17x4xf32, #tpu.memory_space<vmem>>, vector<1x1x15x4xf32>
      %152 = vector.shape_cast %151 : vector<1x1x15x4xf32> to vector<15x4xf32>
      %153 = arith.truncf %152 : vector<15x4xf32> to vector<15x4xbf16>
      %c2_i32_132 = arith.constant 2 : i32
      %154 = arith.addi %arg8, %c2_i32_132 : i32
      %c0_133 = arith.constant 0 : index
      %155 = arith.index_cast %154 : i32 to index
      %c2_134 = arith.constant 2 : index
      %c0_135 = arith.constant 0 : index
      %156 = vector.load %arg2[%c0_133, %155, %c2_134, %c0_135] : memref<1x17x17x128xf32, #tpu.memory_space<vmem>>, vector<1x1x15x128xf32>
      %157 = vector.shape_cast %156 : vector<1x1x15x128xf32> to vector<15x128xf32>
      %158 = arith.truncf %157 : vector<15x128xf32> to vector<15x128xbf16>
      %c8 = arith.constant 8 : index
      %c0_136 = arith.constant 0 : index
      %c0_137 = arith.constant 0 : index
      %159 = vector.load %arg3[%c8, %c0_136, %c0_137] : memref<9x4x128xbf16, #tpu.memory_space<vmem>>, vector<1x4x128xbf16>
      %160 = vector.shape_cast %159 : vector<1x4x128xbf16> to vector<4x128xbf16>
      %cst_138 = arith.constant dense<0.000000e+00> : vector<15x128xf32>
      %161 = tpu.matmul %153, %160, %cst_138 {dimension_numbers = #tpu.dot_dimension_numbers<[1], [0], [0], [1], [0, 0, 1, 1], [], []>} : vector<15x4xbf16>, vector<4x128xbf16>, vector<15x128xf32> -> vector<15x128xf32>
      %162 = arith.addf %148, %161 : vector<15x128xf32>
      %c8_139 = arith.constant 8 : index
      %c0_140 = arith.constant 0 : index
      %c0_141 = arith.constant 0 : index
      %163 = vector.load %arg4[%c8_139, %c0_140, %c0_141] : memref<9x128x128xbf16, #tpu.memory_space<vmem>>, vector<1x128x128xbf16>
      %164 = vector.shape_cast %163 : vector<1x128x128xbf16> to vector<128x128xbf16>
      %cst_142 = arith.constant dense<0.000000e+00> : vector<15x128xf32>
      %165 = tpu.matmul %158, %164, %cst_142 {dimension_numbers = #tpu.dot_dimension_numbers<[1], [0], [0], [1], [0, 0, 1, 1], [], []>} : vector<15x128xbf16>, vector<128x128xbf16>, vector<15x128xf32> -> vector<15x128xf32>
      %166 = arith.addf %162, %165 : vector<15x128xf32>
      %cst_143 = arith.constant 0.000000e+00 : f32
      %167 = vector.broadcast %cst_143 : f32 to vector<15x128xf32>
      %168 = arith.maximumf %166, %167 : vector<15x128xf32>
      %c1_i32_144 = arith.constant 1 : i32
      %169 = arith.addi %arg8, %c1_i32_144 : i32
      %170 = arith.index_cast %169 : i32 to index
      %c1_145 = arith.constant 1 : index
      %c0_146 = arith.constant 0 : index
      %171 = vector.load %arg7[%170, %c1_145, %c0_146] : memref<17x17x128xf32, #tpu.memory_space<vmem>>, vector<1x15x128xf32>
      %172 = vector.shape_cast %171 : vector<1x15x128xf32> to vector<15x128xf32>
      %173 = vector.shape_cast %168 : vector<15x128xf32> to vector<1x15x128xf32>
      tpu.vector_store %arg7[%170, %c1_145, %c0_146], %173 {strides = array<i32>} : memref<17x17x128xf32, #tpu.memory_space<vmem>>, vector<1x15x128xf32>,
    }
    %c15_i32_2 = arith.constant 15 : i32
    %c0_i32_3 = arith.constant 0 : i32
    %c15_i32_4 = arith.constant 15 : i32
    %3 = arith.addi %c0_i32_3, %c15_i32_4 : i32
    %c1_i32_5 = arith.constant 1 : i32
    scf.for %arg8 = %c0_i32_3 to %3 step %c1_i32_5  : i32 {
      %cst_7 = arith.constant 0.000000e+00 : f32
      %4 = vector.broadcast %cst_7 : f32 to vector<15x128xf32>
      %c0_i32_8 = arith.constant 0 : i32
      %5 = arith.addi %arg8, %c0_i32_8 : i32
      %6 = arith.index_cast %5 : i32 to index
      %c0_9 = arith.constant 0 : index
      %c0_10 = arith.constant 0 : index
      %7 = vector.load %arg7[%6, %c0_9, %c0_10] : memref<17x17x128xf32, #tpu.memory_space<vmem>>, vector<1x15x128xf32>
      %8 = vector.shape_cast %7 : vector<1x15x128xf32> to vector<15x128xf32>
      %9 = arith.truncf %8 : vector<15x128xf32> to vector<15x128xbf16>
      %c0_11 = arith.constant 0 : index
      %c0_12 = arith.constant 0 : index
      %c0_13 = arith.constant 0 : index
      %10 = vector.load %arg5[%c0_11, %c0_12, %c0_13] : memref<9x128x128xbf16, #tpu.memory_space<vmem>>, vector<1x128x128xbf16>
      %11 = vector.shape_cast %10 : vector<1x128x128xbf16> to vector<128x128xbf16>
      %cst_14 = arith.constant dense<0.000000e+00> : vector<15x128xf32>
      %12 = tpu.matmul %9, %11, %cst_14 {dimension_numbers = #tpu.dot_dimension_numbers<[1], [0], [0], [1], [0, 0, 1, 1], [], []>} : vector<15x128xbf16>, vector<128x128xbf16>, vector<15x128xf32> -> vector<15x128xf32>
      %13 = arith.addf %4, %12 : vector<15x128xf32>
      %c0_i32_15 = arith.constant 0 : i32
      %14 = arith.addi %arg8, %c0_i32_15 : i32
      %15 = arith.index_cast %14 : i32 to index
      %c1 = arith.constant 1 : index
      %c0_16 = arith.constant 0 : index
      %16 = vector.load %arg7[%15, %c1, %c0_16] : memref<17x17x128xf32, #tpu.memory_space<vmem>>, vector<1x15x128xf32>
      %17 = vector.shape_cast %16 : vector<1x15x128xf32> to vector<15x128xf32>
      %18 = arith.truncf %17 : vector<15x128xf32> to vector<15x128xbf16>
      %c1_17 = arith.constant 1 : index
      %c0_18 = arith.constant 0 : index
      %c0_19 = arith.constant 0 : index
      %19 = vector.load %arg5[%c1_17, %c0_18, %c0_19] : memref<9x128x128xbf16, #tpu.memory_space<vmem>>, vector<1x128x128xbf16>
      %20 = vector.shape_cast %19 : vector<1x128x128xbf16> to vector<128x128xbf16>
      %cst_20 = arith.constant dense<0.000000e+00> : vector<15x128xf32>
      %21 = tpu.matmul %18, %20, %cst_20 {dimension_numbers = #tpu.dot_dimension_numbers<[1], [0], [0], [1], [0, 0, 1, 1], [], []>} : vector<15x128xbf16>, vector<128x128xbf16>, vector<15x128xf32> -> vector<15x128xf32>
      %22 = arith.addf %13, %21 : vector<15x128xf32>
      %c0_i32_21 = arith.constant 0 : i32
      %23 = arith.addi %arg8, %c0_i32_21 : i32
      %24 = arith.index_cast %23 : i32 to index
      %c2 = arith.constant 2 : index
      %c0_22 = arith.constant 0 : index
      %25 = vector.load %arg7[%24, %c2, %c0_22] : memref<17x17x128xf32, #tpu.memory_space<vmem>>, vector<1x15x128xf32>
      %26 = vector.shape_cast %25 : vector<1x15x128xf32> to vector<15x128xf32>
      %27 = arith.truncf %26 : vector<15x128xf32> to vector<15x128xbf16>
      %c2_23 = arith.constant 2 : index
      %c0_24 = arith.constant 0 : index
      %c0_25 = arith.constant 0 : index
      %28 = vector.load %arg5[%c2_23, %c0_24, %c0_25] : memref<9x128x128xbf16, #tpu.memory_space<vmem>>, vector<1x128x128xbf16>
      %29 = vector.shape_cast %28 : vector<1x128x128xbf16> to vector<128x128xbf16>
      %cst_26 = arith.constant dense<0.000000e+00> : vector<15x128xf32>
      %30 = tpu.matmul %27, %29, %cst_26 {dimension_numbers = #tpu.dot_dimension_numbers<[1], [0], [0], [1], [0, 0, 1, 1], [], []>} : vector<15x128xbf16>, vector<128x128xbf16>, vector<15x128xf32> -> vector<15x128xf32>
      %31 = arith.addf %22, %30 : vector<15x128xf32>
      %c1_i32_27 = arith.constant 1 : i32
      %32 = arith.addi %arg8, %c1_i32_27 : i32
      %33 = arith.index_cast %32 : i32 to index
      %c0_28 = arith.constant 0 : index
      %c0_29 = arith.constant 0 : index
      %34 = vector.load %arg7[%33, %c0_28, %c0_29] : memref<17x17x128xf32, #tpu.memory_space<vmem>>, vector<1x15x128xf32>
      %35 = vector.shape_cast %34 : vector<1x15x128xf32> to vector<15x128xf32>
      %36 = arith.truncf %35 : vector<15x128xf32> to vector<15x128xbf16>
      %c3 = arith.constant 3 : index
      %c0_30 = arith.constant 0 : index
      %c0_31 = arith.constant 0 : index
      %37 = vector.load %arg5[%c3, %c0_30, %c0_31] : memref<9x128x128xbf16, #tpu.memory_space<vmem>>, vector<1x128x128xbf16>
      %38 = vector.shape_cast %37 : vector<1x128x128xbf16> to vector<128x128xbf16>
      %cst_32 = arith.constant dense<0.000000e+00> : vector<15x128xf32>
      %39 = tpu.matmul %36, %38, %cst_32 {dimension_numbers = #tpu.dot_dimension_numbers<[1], [0], [0], [1], [0, 0, 1, 1], [], []>} : vector<15x128xbf16>, vector<128x128xbf16>, vector<15x128xf32> -> vector<15x128xf32>
      %40 = arith.addf %31, %39 : vector<15x128xf32>
      %c1_i32_33 = arith.constant 1 : i32
      %41 = arith.addi %arg8, %c1_i32_33 : i32
      %42 = arith.index_cast %41 : i32 to index
      %c1_34 = arith.constant 1 : index
      %c0_35 = arith.constant 0 : index
      %43 = vector.load %arg7[%42, %c1_34, %c0_35] : memref<17x17x128xf32, #tpu.memory_space<vmem>>, vector<1x15x128xf32>
      %44 = vector.shape_cast %43 : vector<1x15x128xf32> to vector<15x128xf32>
      %45 = arith.truncf %44 : vector<15x128xf32> to vector<15x128xbf16>
      %c4 = arith.constant 4 : index
      %c0_36 = arith.constant 0 : index
      %c0_37 = arith.constant 0 : index
      %46 = vector.load %arg5[%c4, %c0_36, %c0_37] : memref<9x128x128xbf16, #tpu.memory_space<vmem>>, vector<1x128x128xbf16>
      %47 = vector.shape_cast %46 : vector<1x128x128xbf16> to vector<128x128xbf16>
      %cst_38 = arith.constant dense<0.000000e+00> : vector<15x128xf32>
      %48 = tpu.matmul %45, %47, %cst_38 {dimension_numbers = #tpu.dot_dimension_numbers<[1], [0], [0], [1], [0, 0, 1, 1], [], []>} : vector<15x128xbf16>, vector<128x128xbf16>, vector<15x128xf32> -> vector<15x128xf32>
      %49 = arith.addf %40, %48 : vector<15x128xf32>
      %c1_i32_39 = arith.constant 1 : i32
      %50 = arith.addi %arg8, %c1_i32_39 : i32
      %51 = arith.index_cast %50 : i32 to index
      %c2_40 = arith.constant 2 : index
      %c0_41 = arith.constant 0 : index
      %52 = vector.load %arg7[%51, %c2_40, %c0_41] : memref<17x17x128xf32, #tpu.memory_space<vmem>>, vector<1x15x128xf32>
      %53 = vector.shape_cast %52 : vector<1x15x128xf32> to vector<15x128xf32>
      %54 = arith.truncf %53 : vector<15x128xf32> to vector<15x128xbf16>
      %c5 = arith.constant 5 : index
      %c0_42 = arith.constant 0 : index
      %c0_43 = arith.constant 0 : index
      %55 = vector.load %arg5[%c5, %c0_42, %c0_43] : memref<9x128x128xbf16, #tpu.memory_space<vmem>>, vector<1x128x128xbf16>
      %56 = vector.shape_cast %55 : vector<1x128x128xbf16> to vector<128x128xbf16>
      %cst_44 = arith.constant dense<0.000000e+00> : vector<15x128xf32>
      %57 = tpu.matmul %54, %56, %cst_44 {dimension_numbers = #tpu.dot_dimension_numbers<[1], [0], [0], [1], [0, 0, 1, 1], [], []>} : vector<15x128xbf16>, vector<128x128xbf16>, vector<15x128xf32> -> vector<15x128xf32>
      %58 = arith.addf %49, %57 : vector<15x128xf32>
      %c2_i32 = arith.constant 2 : i32
      %59 = arith.addi %arg8, %c2_i32 : i32
      %60 = arith.index_cast %59 : i32 to index
      %c0_45 = arith.constant 0 : index
      %c0_46 = arith.constant 0 : index
      %61 = vector.load %arg7[%60, %c0_45, %c0_46] : memref<17x17x128xf32, #tpu.memory_space<vmem>>, vector<1x15x128xf32>
      %62 = vector.shape_cast %61 : vector<1x15x128xf32> to vector<15x128xf32>
      %63 = arith.truncf %62 : vector<15x128xf32> to vector<15x128xbf16>
      %c6 = arith.constant 6 : index
      %c0_47 = arith.constant 0 : index
      %c0_48 = arith.constant 0 : index
      %64 = vector.load %arg5[%c6, %c0_47, %c0_48] : memref<9x128x128xbf16, #tpu.memory_space<vmem>>, vector<1x128x128xbf16>
      %65 = vector.shape_cast %64 : vector<1x128x128xbf16> to vector<128x128xbf16>
      %cst_49 = arith.constant dense<0.000000e+00> : vector<15x128xf32>
      %66 = tpu.matmul %63, %65, %cst_49 {dimension_numbers = #tpu.dot_dimension_numbers<[1], [0], [0], [1], [0, 0, 1, 1], [], []>} : vector<15x128xbf16>, vector<128x128xbf16>, vector<15x128xf32> -> vector<15x128xf32>
      %67 = arith.addf %58, %66 : vector<15x128xf32>
      %c2_i32_50 = arith.constant 2 : i32
      %68 = arith.addi %arg8, %c2_i32_50 : i32
      %69 = arith.index_cast %68 : i32 to index
      %c1_51 = arith.constant 1 : index
      %c0_52 = arith.constant 0 : index
      %70 = vector.load %arg7[%69, %c1_51, %c0_52] : memref<17x17x128xf32, #tpu.memory_space<vmem>>, vector<1x15x128xf32>
      %71 = vector.shape_cast %70 : vector<1x15x128xf32> to vector<15x128xf32>
      %72 = arith.truncf %71 : vector<15x128xf32> to vector<15x128xbf16>
      %c7 = arith.constant 7 : index
      %c0_53 = arith.constant 0 : index
      %c0_54 = arith.constant 0 : index
      %73 = vector.load %arg5[%c7, %c0_53, %c0_54] : memref<9x128x128xbf16, #tpu.memory_space<vmem>>, vector<1x128x128xbf16>
      %74 = vector.shape_cast %73 : vector<1x128x128xbf16> to vector<128x128xbf16>
      %cst_55 = arith.constant dense<0.000000e+00> : vector<15x128xf32>
      %75 = tpu.matmul %72, %74, %cst_55 {dimension_numbers = #tpu.dot_dimension_numbers<[1], [0], [0], [1], [0, 0, 1, 1], [], []>} : vector<15x128xbf16>, vector<128x128xbf16>, vector<15x128xf32> -> vector<15x128xf32>
      %76 = arith.addf %67, %75 : vector<15x128xf32>
      %c2_i32_56 = arith.constant 2 : i32
      %77 = arith.addi %arg8, %c2_i32_56 : i32
      %78 = arith.index_cast %77 : i32 to index
      %c2_57 = arith.constant 2 : index
      %c0_58 = arith.constant 0 : index
      %79 = vector.load %arg7[%78, %c2_57, %c0_58] : memref<17x17x128xf32, #tpu.memory_space<vmem>>, vector<1x15x128xf32>
      %80 = vector.shape_cast %79 : vector<1x15x128xf32> to vector<15x128xf32>
      %81 = arith.truncf %80 : vector<15x128xf32> to vector<15x128xbf16>
      %c8 = arith.constant 8 : index
      %c0_59 = arith.constant 0 : index
      %c0_60 = arith.constant 0 : index
      %82 = vector.load %arg5[%c8, %c0_59, %c0_60] : memref<9x128x128xbf16, #tpu.memory_space<vmem>>, vector<1x128x128xbf16>
      %83 = vector.shape_cast %82 : vector<1x128x128xbf16> to vector<128x128xbf16>
      %cst_61 = arith.constant dense<0.000000e+00> : vector<15x128xf32>
      %84 = tpu.matmul %81, %83, %cst_61 {dimension_numbers = #tpu.dot_dimension_numbers<[1], [0], [0], [1], [0, 0, 1, 1], [], []>} : vector<15x128xbf16>, vector<128x128xbf16>, vector<15x128xf32> -> vector<15x128xf32>
      %85 = arith.addf %76, %84 : vector<15x128xf32>
      %cst_62 = arith.constant 0.000000e+00 : f32
      %86 = vector.broadcast %cst_62 : f32 to vector<15x128xf32>
      %87 = arith.maximumf %85, %86 : vector<15x128xf32>
      %c0_63 = arith.constant 0 : index
      %88 = arith.index_cast %arg8 : i32 to index
      %c0_64 = arith.constant 0 : index
      %c0_65 = arith.constant 0 : index
      %89 = vector.load %arg6[%c0_63, %88, %c0_64, %c0_65] : memref<1x15x15x128xf32, #tpu.memory_space<vmem>>, vector<1x1x15x128xf32>
      %90 = vector.shape_cast %89 : vector<1x1x15x128xf32> to vector<15x128xf32>
      %91 = vector.shape_cast %87 : vector<15x128xf32> to vector<1x1x15x128xf32>
      tpu.vector_store %arg6[%c0_63, %88, %c0_64, %c0_65], %91 {strides = array<i32>} : memref<1x15x15x128xf32, #tpu.memory_space<vmem>>, vector<1x1x15x128xf32>,
    }
    %c15_i32_6 = arith.constant 15 : i32
    return
  }
  func.func @transform_0(%arg0: i32) -> (i32, i32, i32, i32) {
    %c0_i32 = arith.constant 0 : i32
    %c0_i32_0 = arith.constant 0 : i32
    %c0_i32_1 = arith.constant 0 : i32
    %c0_i32_2 = arith.constant 0 : i32
    return %arg0, %c0_i32, %c0_i32_0, %c0_i32_1 : i32, i32, i32, i32
  }
  func.func @transform_1(%arg0: i32) -> (i32, i32, i32, i32) {
    %c0_i32 = arith.constant 0 : i32
    %c0_i32_0 = arith.constant 0 : i32
    %c0_i32_1 = arith.constant 0 : i32
    %c0_i32_2 = arith.constant 0 : i32
    return %arg0, %c0_i32, %c0_i32_0, %c0_i32_1 : i32, i32, i32, i32
  }
  func.func @transform_2(%arg0: i32) -> (i32, i32, i32) {
    %c0_i32 = arith.constant 0 : i32
    %c0_i32_0 = arith.constant 0 : i32
    %c0_i32_1 = arith.constant 0 : i32
    %c0_i32_2 = arith.constant 0 : i32
    return %c0_i32, %c0_i32_0, %c0_i32_1 : i32, i32, i32
  }
  func.func @transform_3(%arg0: i32) -> (i32, i32, i32) {
    %c0_i32 = arith.constant 0 : i32
    %c0_i32_0 = arith.constant 0 : i32
    %c0_i32_1 = arith.constant 0 : i32
    %c0_i32_2 = arith.constant 0 : i32
    return %c0_i32, %c0_i32_0, %c0_i32_1 : i32, i32, i32
  }
  func.func @transform_4(%arg0: i32) -> (i32, i32, i32) {
    %c0_i32 = arith.constant 0 : i32
    %c0_i32_0 = arith.constant 0 : i32
    %c0_i32_1 = arith.constant 0 : i32
    %c0_i32_2 = arith.constant 0 : i32
    return %c0_i32, %c0_i32_0, %c0_i32_1 : i32, i32, i32
  }
  func.func @transform_5(%arg0: i32) -> (i32, i32, i32, i32) {
    %c0_i32 = arith.constant 0 : i32
    %c0_i32_0 = arith.constant 0 : i32
    %c0_i32_1 = arith.constant 0 : i32
    %c0_i32_2 = arith.constant 0 : i32
    return %arg0, %c0_i32, %c0_i32_0, %c0_i32_1 : i32, i32, i32, i32
  }
}

</mosaic_0001>

<bundles_post_ra>
// kernel: decoder_block_forward.2
= control target key start
LH: loop header
LB: loop body
LE: loop exit
PB: predicated region body
PF: predicated region fallthrough
CT: control target
= control target key end

     0   :  { %s547_s9 = smov 0   ;;  %s607_s0 = inlined_call_operand.vmem [shape: f32[2,16,16,8], index: 0, kind: input, shape index: {}]   ;;  %s608_s1 = inlined_call_operand.vmem [shape: bf16[4,8,128], index: 1, kind: input, shape index: {}]   ;;  %s609_s2 = inlined_call_operand.vmem [shape: f32[2,15,15,128], index: 2, kind: output, shape index: {}]  }
   0x1 LB: > { %s439_s10 = sadd.s32 4294967295, %s524_s9   ;;  %p443_p0 = scmp.ge.s32.totalorder %s524_s9, 1  ;;  %s524_s9 = sphi %s547_s9, %s12_s9  }
   0x2   : > { %p112_p1 = scmp.lt.s32.totalorder %s524_s9, 3 }
   0x4   : > { %p113_p2 = pnand %p443_p0, %p112_p1 }
   0x5   : > { %p134_p3 = scmp.lt.s32.totalorder (!%p113_p2), %s439_s10, 1  ;;  %s565_s19 = smov (!%p113_p2), 0  }
   0x6   : > { %116 = sbr.rel (%p113_p2) target bundleno = 231 (0xe7), region = 28 }
   0xb   : > { %s611_s10 = smov (!%p134_p3, %s439_s10), 1 }
   0xc   : > { %s462_s11 = sshll.u32 %s611_s10, 8  ;;  %s495_s12 = smul.u32 240, %s611_s10 }
   0xd   : > { %s558_s15 = scalar_lea.vmem %s607_s0, %s462_s11 }
   0xe   : > { %s563_s18 = scalar_lea.vmem %s609_s2, %s495_s12 }
   0xf LB: >> { %v448_v0 = vld [vmem:[%s608_s1 + $0x4] sm:$0xf]  ;;  %vm166_vm0 = vcmask 1043456   ;;  %v156_v1 = vld [vmem:[%s608_s1] sm:$0xf]  ;;  %v530_v2 = vmov 0.0   ;;  %s528_s19 = sphi %s565_s19, %s150_s19  }
  0x10   : >> { %471 = vmatprep.subr.bf16.mxu0 %v530_v2  ;;  %v168_v3 = vsel %vm166_vm0, %v448_v0, 0  ;;  %477 = vmatprep.subr.bf16.mxu1 %v530_v2  ;;  %v215_v4 = vsel %vm166_vm0, %v156_v1, 0  ;;  %s447_s24 = sshll.u32 %s528_s19, 4  ;;  %v454_v5 = vld [vmem:[%s608_s1 + $0x8] sm:$0xf]  ;;  %vm531_vm1 = vmmov 0  }
  0x11   : >> { %472 = vmatpush3.bf16.msra.mxu0 %v168_v3  ;;  %478 = vmatpush3.bf16.msra.mxu1 %v215_v4  ;;  %s152_s27 = scalar_lea.vmem %s558_s15, %s447_s24  ;;  %v458_v6 = vld [vmem:[%s608_s1 + $0xc] sm:$0xf]  ;;  %vm162_vm2 = vcmask 64512   ;;  %v270_v12 = vsel %vm166_vm0, %v454_v5, 0  ;;  %s369_s30 = scalar_lea.vmem %s563_s18, %s447_s24 }
  0x12   : >> { %473 = vmatprep.mubr.msk.bf16.mxu0 %vm531_vm1, %v530_v2  ;;  %479 = vmatprep.mubr.msk.bf16.mxu1 %vm531_vm1, %v530_v2  ;;  %v157_v7 = vld [vmem:[%s152_s27 + $0x1] sm:$0xff]  ;;  %v158_v8 = vld [vmem:[%s152_s27 + $0x9] sm:$0x7f]  ;;  %v324_v14 = vsel %vm166_vm0, %v458_v6, 0  ;;  %v452_v15 = vld [vmem:[%s152_s27 + $0x10] sm:$0xff]  ;;  %s150_s19 = sadd.s32 1, %s528_s19  }
  0x13   : >> { %483 = vmatprep.subr.bf16.mxu0 %v530_v2  ;;  %v153_v9 = vld [vmem:[%s152_s27] sm:$0xff]  ;;  %489 = vmatprep.subr.bf16.mxu1 %v530_v2  ;;  %v159_v10 = vpack.c.bf16 %v158_v8, %v157_v7  ;;  %v154_v11 = vld [vmem:[%s152_s27 + $0x8] sm:$0x7f]  ;;  %v453_v16 = vld [vmem:[%s152_s27 + $0x18] sm:$0x7f]  ;;  %p147_p4 = scmp.ge.s32.totalorder %s150_s19, 15  }
  0x14   : >> { %v155_v13 = vpack.c.bf16 %v154_v11, %v153_v9  ;;  %v456_v17 = vld [vmem:[%s152_s27 + $0x11] sm:$0xff]  ;;  %v457_v18 = vld [vmem:[%s152_s27 + $0x19] sm:$0x7f]  ;;  %v263_v19 = vpack.c.bf16 %v453_v16, %v452_v15 }
  0x15   : >> { %474 = vmatmul.mubr.msk.bf16.vlgmr.msra.gmra.mxu0 %vm162_vm2, %v159_v10  ;;  %v317_v20 = vpack.c.bf16 %v457_v18, %v456_v17 }
  0x16   : >> { %480 = vmatmul.mubr.msk.bf16.vlgmr.msra.gmra.mxu1 %vm162_vm2, %v155_v13  ;;  %484 = vmatpush3.bf16.msra.mxu0 %v270_v12 }
  0x17   : >> { %490 = vmatpush3.bf16.msra.mxu1 %v324_v14  ;;  %485 = vmatprep.mubr.msk.bf16.mxu0 %vm531_vm1, %v530_v2 }
  0x18   : >> { %491 = vmatprep.mubr.msk.bf16.mxu1 %vm531_vm1, %v530_v2 }
  0x1d   : >> { %486 = vmatmul.mubr.msk.bf16.vlgmr.msra.gmra.mxu0 %vm162_vm2, %v263_v19 }
  0x1e   : >> { %492 = vmatmul.mubr.msk.bf16.vlgmr.msra.gmra.mxu1 %vm162_vm2, %v317_v20 }
  0xd5   : >> { %v204_v21 = vpop.f32.mrf.mxu0 }
  0xd6   : >> { %v251_v22 = vpop.f32.mrf.mxu1 }
  0xd7   : >> { %v475_v23 = vpop.f32.mrf.mxu0  ;;  %v252_v28 = vadd.f32 %v251_v22, %v204_v21 }
  0xd8   : >> { %v481_v24 = vpop.f32.mrf.mxu1 }
  0xd9   : >> { %v207_v25 = vpop.f32.mrf.mxu0 }
  0xda   : >> { %v254_v26 = vpop.f32.mrf.mxu1 }
  0xdb   : >> { %v476_v27 = vpop.f32.mrf.mxu0  ;;  %v255_v34 = vadd.f32 %v254_v26, %v207_v25 }
  0xdc   : >> { %v482_v29 = vpop.f32.mrf.mxu1 }
  0xdd   : >> { %v306_v30 = vpop.f32.mrf.mxu0 }
  0xde   : >> { %v313_v31 = vadd.f32 %v306_v30, %v252_v28  ;;  %v360_v32 = vpop.f32.mrf.mxu1 }
  0xdf   : >> { %v487_v33 = vpop.f32.mrf.mxu0 }
  0xe0   : >> { %v367_v35 = vadd.f32 %v360_v32, %v313_v31  ;;  %v493_v36 = vpop.f32.mrf.mxu1 }
  0xe1   : >> { %v309_v37 = vpop.f32.mrf.mxu0 }
  0xe2   : >> { %370 = vst [vmem:[%s369_s30] sm:$0xff] %v367_v35  ;;  %v314_v38 = vadd.f32 %v309_v37, %v255_v34  ;;  %v363_v39 = vpop.f32.mrf.mxu1  ;;  %149 = sbr.rel (!%p147_p4) target bundleno = 15 (0xf), region = 71 }
  0xe3   : >> { %v488_v40 = vpop.f32.mrf.mxu0 }
  0xe4   : >> { %v368_v41 = vadd.f32 %v363_v39, %v314_v38  ;;  %v494_v42 = vpop.f32.mrf.mxu1 }
  0xe6   : >> { %371 = vst [vmem:[%s369_s30 + $0x8] sm:$0x7f] %v368_v41 }
  0xe7 PF: > { %s12_s9 = sadd.s32 1, %s524_s9  }
  0xe8   : > { %p9_p5 = scmp.ge.s32.totalorder %s12_s9, 4  }
  0xea   :  { %11 = sbr.rel (!%p9_p5) target bundleno = 1 (0x1), region = 82 }

// kernel: decoder_block_forward.3
= control target key start
LH: loop header
LB: loop body
LE: loop exit
PB: predicated region body
PF: predicated region fallthrough
CT: control target
= control target key end

     0   :  { %s4214_s18 = smov 0   ;;  %s5021_s0 = inlined_call_operand.vmem [shape: f32[2,17,17,4], index: 0, kind: input, shape index: {}]   ;;  %s5022_s1 = inlined_call_operand.vmem [shape: f32[2,17,17,128], index: 1, kind: input, shape index: {}]   ;;  %s5023_s2 = inlined_call_operand.vmem [shape: bf16[9,4,128], index: 2, kind: input, shape index: {}]   ;;  %s5024_s3 = inlined_call_operand.vmem [shape: bf16[9,128,128], index: 3, kind: input, shape index: {}]   ;;  %s5025_s4 = inlined_call_operand.vmem [shape: bf16[9,128,128], index: 4, kind: input, shape index: {}]   ;;  %s5026_s5 = inlined_call_operand.vmem [shape: f32[2,15,15,128], index: 5, kind: output, shape index: {}]  }
   0x1 LB: > { %s2920_s19 = sadd.s32 4294967295, %s4169_s18   ;;  %p2924_p0 = scmp.ge.s32.totalorder %s4169_s18, 1  ;;  %s4169_s18 = sphi %s4214_s18, %s15_s18  }
   0x2   : > { %p197_p1 = scmp.lt.s32.totalorder %s4169_s18, 3 }
   0x4   : > { %p198_p2 = pnand %p2924_p0, %p197_p1 }
   0x5   : > { %p4224_p3 = scmp.lt.s32.totalorder (!%p198_p2), %s2920_s19, 1  ;;  %s4247_s7 = smov (!%p198_p2), 0  }
   0x6   : > { %201 = sbr.rel (%p198_p2) target bundleno = 790 (0x316), region = 40 }
   0xb   : > { %v4179_v0 = vmov 0.0   ;;  %s5029_s19 = smov (!%p4224_p3, %s2920_s19), 1 }
   0xc   : > { %246 = vst [vmem:[#allocation2] sm:$0xff] %v4179_v0  ;;  %247 = vst [vmem:[#allocation2 + $0x8] sm:$0xff] %v4179_v0  ;;  %s3980_s21 = smul.u32 408, %s5029_s19 }
   0xd   : > { %248 = vst [vmem:[#allocation2 + $0x10] sm:$0x1] %v4179_v0  ;;  %249 = vst [vmem:[#allocation2 + $0x18] sm:$0xff] %v4179_v0  ;;  %s3981_s22 = smul.u32 240, %s5029_s19 }
   0xe   : > { %250 = vst [vmem:[#allocation2 + $0x20] sm:$0xff] %v4179_v0  ;;  %251 = vst [vmem:[#allocation2 + $0x28] sm:$0x1] %v4179_v0  ;;  %s4235_s25 = scalar_lea.vmem %s5021_s0, %s3980_s21  ;;  %s4240_s28 = scalar_lea.vmem %s5022_s1, %s3980_s21 }
   0xf   : > { %252 = vst [vmem:[#allocation2 + $0x30] sm:$0xff] %v4179_v0  ;;  %253 = vst [vmem:[#allocation2 + $0x38] sm:$0xff] %v4179_v0  ;;  %s4245_s6 = scalar_lea.vmem %s5026_s5, %s3981_s22 }
  0x10   : > { %254 = vst [vmem:[#allocation2 + $0x40] sm:$0x1] %v4179_v0  ;;  %255 = vst [vmem:[#allocation2 + $0x48] sm:$0xff] %v4179_v0 }
  0x11   : > { %256 = vst [vmem:[#allocation2 + $0x50] sm:$0xff] %v4179_v0  ;;  %257 = vst [vmem:[#allocation2 + $0x58] sm:$0x1] %v4179_v0 }
  0x12   : > { %258 = vst [vmem:[#allocation2 + $0x60] sm:$0xff] %v4179_v0  ;;  %259 = vst [vmem:[#allocation2 + $0x68] sm:$0xff] %v4179_v0 }
  0x13   : > { %260 = vst [vmem:[#allocation2 + $0x70] sm:$0x1] %v4179_v0  ;;  %261 = vst [vmem:[#allocation2 + $0x78] sm:$0xff] %v4179_v0 }
  0x14   : > { %262 = vst [vmem:[#allocation2 + $0x80] sm:$0xff] %v4179_v0  ;;  %263 = vst [vmem:[#allocation2 + $0x88] sm:$0x1] %v4179_v0 }
  0x15   : > { %264 = vst [vmem:[#allocation2 + $0x90] sm:$0xff] %v4179_v0  ;;  %265 = vst [vmem:[#allocation2 + $0x98] sm:$0xff] %v4179_v0 }
  0x16   : > { %266 = vst [vmem:[#allocation2 + $0xa0] sm:$0x1] %v4179_v0  ;;  %267 = vst [vmem:[#allocation2 + $0xa8] sm:$0xff] %v4179_v0 }
  0x17   : > { %268 = vst [vmem:[#allocation2 + $0xb0] sm:$0xff] %v4179_v0  ;;  %269 = vst [vmem:[#allocation2 + $0xb8] sm:$0x1] %v4179_v0 }
  0x18   : > { %270 = vst [vmem:[#allocation2 + $0xc0] sm:$0xff] %v4179_v0  ;;  %271 = vst [vmem:[#allocation2 + $0xc8] sm:$0xff] %v4179_v0 }
  0x19   : > { %272 = vst [vmem:[#allocation2 + $0xd0] sm:$0x1] %v4179_v0  ;;  %273 = vst [vmem:[#allocation2 + $0xd8] sm:$0xff] %v4179_v0 }
  0x1a   : > { %274 = vst [vmem:[#allocation2 + $0xe0] sm:$0xff] %v4179_v0  ;;  %275 = vst [vmem:[#allocation2 + $0xe8] sm:$0x1] %v4179_v0 }
  0x1b   : > { %276 = vst [vmem:[#allocation2 + $0xf0] sm:$0xff] %v4179_v0  ;;  %277 = vst [vmem:[#allocation2 + $0xf8] sm:$0xff] %v4179_v0 }
  0x1c   : > { %278 = vst [vmem:[#allocation2 + $0x100] sm:$0x1] %v4179_v0  ;;  %279 = vst [vmem:[#allocation2 + $0x108] sm:$0xff] %v4179_v0 }
  0x1d   : > { %280 = vst [vmem:[#allocation2 + $0x110] sm:$0xff] %v4179_v0  ;;  %281 = vst [vmem:[#allocation2 + $0x118] sm:$0x1] %v4179_v0 }
  0x1e   : > { %282 = vst [vmem:[#allocation2 + $0x120] sm:$0xff] %v4179_v0  ;;  %283 = vst [vmem:[#allocation2 + $0x128] sm:$0xff] %v4179_v0 }
  0x1f   : > { %284 = vst [vmem:[#allocation2 + $0x130] sm:$0x1] %v4179_v0  ;;  %285 = vst [vmem:[#allocation2 + $0x138] sm:$0xff] %v4179_v0 }
  0x20   : > { %286 = vst [vmem:[#allocation2 + $0x140] sm:$0xff] %v4179_v0  ;;  %287 = vst [vmem:[#allocation2 + $0x148] sm:$0x1] %v4179_v0 }
  0x21   : > { %288 = vst [vmem:[#allocation2 + $0x150] sm:$0xff] %v4179_v0  ;;  %289 = vst [vmem:[#allocation2 + $0x158] sm:$0xff] %v4179_v0 }
  0x22   : > { %290 = vst [vmem:[#allocation2 + $0x160] sm:$0x1] %v4179_v0  ;;  %291 = vst [vmem:[#allocation2 + $0x168] sm:$0xff] %v4179_v0 }
  0x23   : > { %292 = vst [vmem:[#allocation2 + $0x170] sm:$0xff] %v4179_v0  ;;  %293 = vst [vmem:[#allocation2 + $0x178] sm:$0x1] %v4179_v0 }
  0x24   : > { %294 = vst [vmem:[#allocation2 + $0x180] sm:$0xff] %v4179_v0  ;;  %295 = vst [vmem:[#allocation2 + $0x188] sm:$0xff] %v4179_v0 }
  0x25   : > { %296 = vst [vmem:[#allocation2 + $0x190] sm:$0x1] %v4179_v0 }
  0x26 LB: >> { %v4011_v1 = vld [vmem:[%s5024_s3 + $0x38] sm:$0xff]   ;;  %v4180_v2 = vmov 0.0   ;;  %v312_v3 = vld [vmem:[%s5023_s2] sm:$0x3]  ;;  %vm422_vm0 = vcmask 1041408   ;;  %v4012_v5 = vld [vmem:[%s5024_s3 + $0x30] sm:$0xff]   ;;  %s4173_s7 = sphi %s4247_s7, %s302_s7  }
  0x27   : >> { %3566 = vmatprep.subr.bf16.mxu0 %v4180_v2  ;;  %3586 = vmatprep.subr.bf16.mxu1 %v4180_v2  ;;  %v424_v4 = vsel %vm422_vm0, %v312_v3, 0  ;;  %s4265_s14 = smul.u32 24, %s4173_s7  ;;  %v2937_v6 = vld [vmem:[%s5023_s2 + $0x2] sm:$0x3]  ;;  %vm4181_vm1 = vmmov 0   ;;  %vm418_vm2 = vcmask 31744  }
  0x28   : >> { %3567 = vmatpush3.bf16.msra.mxu0 %v4011_v1  ;;  %3587 = vmatpush3.bf16.msra.mxu1 %v424_v4  ;;  %v479_v10 = vsel %vm422_vm0, %v2937_v6, 0  ;;  %v4013_v11 = vld [vmem:[%s5024_s3 + $0x28] sm:$0xff]   ;;  %v4014_v14 = vld [vmem:[%s5024_s3 + $0x20] sm:$0xff]   ;;  %v4015_v16 = vld [vmem:[%s5024_s3 + $0x78] sm:$0xff]   ;;  %s302_s7 = sadd.s32 1, %s4173_s7  }
  0x29   : >> { %3568 = vmatprep.subr.bf16.mxu0 %v4180_v2  ;;  %3588 = vmatprep.mubr.msk.bf16.mxu1 %vm4181_vm1, %v4180_v2  ;;  %s4275_s17 = scalar_lea.vmem %s4235_s25, %s4265_s14  ;;  %v4016_v17 = vld [vmem:[%s5024_s3 + $0x18] sm:$0xff]   ;;  %v4017_v18 = vld [vmem:[%s5024_s3 + $0x70] sm:$0xff]   ;;  %v4019_v20 = vld [vmem:[%s5024_s3 + $0x68] sm:$0xff]   ;;  %s4324_s15 = scalar_lea.vmem %s4240_s28, %s4265_s14 }
  0x2a   : >> { %3592 = vmatprep.subr.bf16.mxu1 %v4180_v2  ;;  %v305_v7 = vld [vmem:[%s4275_s17] sm:$0xff]  ;;  %v306_v8 = vld [vmem:[%s4275_s17 + $0x8] sm:$0x7f]  ;;  %3582 = vmatprep.mubr.msk.bf16.mxu0 %vm4181_vm1, %v4180_v2  ;;  %v4018_v19 = vld [vmem:[%s5024_s3 + $0x10] sm:$0xff]   ;;  %p299_p4 = scmp.ge.s32.totalorder %s302_s7, 15  }
  0x2b   : >> { %v307_v9 = vpack.c.bf16 %v306_v8, %v305_v7  ;;  %v467_v12 = vld [vmem:[%s4275_s17 + $0x1] sm:$0xff]  ;;  %v468_v13 = vld [vmem:[%s4275_s17 + $0x9] sm:$0x7f]  ;;  %v4023_v26 = vld [vmem:[%s5024_s3 + $0x58] sm:$0xff]   ;;  %s4681_s16 = smov (%p299_p4), 0  }
  0x2c   : >> { %3569 = vmatpush3.bf16.msra.mxu0 %v4012_v5  ;;  %v469_v15 = vpack.c.bf16 %v468_v13, %v467_v12  ;;  %v4020_v21 = vld [vmem:[%s5024_s3 + $0x8] sm:$0xff]   ;;  %v4021_v22 = vld [vmem:[%s5024_s3 + $0x60] sm:$0xff]   ;;  %v4024_v28 = vld [vmem:[%s5024_s3 + $0xb8] sm:$0xff]  }
  0x2d   : >> { %3570 = vmatprep.subr.bf16.mxu0 %v4180_v2  ;;  %3589 = vmatmul.mubr.msk.bf16.vlgmr.msra.gmra.mxu1 %vm418_vm2, %v307_v9  ;;  %v4022_v23 = vld [vmem:[%s5024_s3] sm:$0xff]   ;;  %v310_v25 = vld [vmem:[%s4324_s15 + $0x8] sm:$0x7f]  ;;  %v4025_v29 = vld [vmem:[%s5024_s3 + $0x50] sm:$0xff]  }
  0x2e   : >> { %3593 = vmatpush3.bf16.msra.mxu1 %v479_v10  ;;  %3594 = vmatprep.mubr.msk.bf16.mxu1 %vm4181_vm1, %v4180_v2  ;;  %v309_v24 = vld [vmem:[%s4324_s15] sm:$0xff]  ;;  %v4026_v30 = vld [vmem:[%s5024_s3 + $0xb0] sm:$0xff]   ;;  %v4027_v31 = vld [vmem:[%s5024_s3 + $0x48] sm:$0xff]  }
  0x2f   : >> { %3598 = vmatprep.subr.bf16.mxu1 %v4180_v2  ;;  %v311_v27 = vpack.c.bf16 %v310_v25, %v309_v24  ;;  %v4028_v32 = vld [vmem:[%s5024_s3 + $0xa8] sm:$0xff]   ;;  %v4029_v33 = vld [vmem:[%s5024_s3 + $0x40] sm:$0xff]   ;;  %v4031_v40 = vld [vmem:[%s5024_s3 + $0x98] sm:$0xff]  }
  0x30   : >> { %3571 = vmatpush3.bf16.msra.mxu0 %v4013_v11  ;;  %v470_v34 = vld [vmem:[%s4324_s15 + $0x1] sm:$0xff]  ;;  %v471_v35 = vld [vmem:[%s4324_s15 + $0x9] sm:$0x7f]  ;;  %v4032_v43 = vld [vmem:[%s5024_s3 + $0x90] sm:$0xff]  }
  0x31   : >> { %3572 = vmatprep.subr.bf16.mxu0 %v4180_v2  ;;  %v4030_v36 = vld [vmem:[%s5024_s3 + $0xa0] sm:$0xff]   ;;  %v472_v38 = vpack.c.bf16 %v471_v35, %v470_v34  ;;  %v633_v42 = vld [vmem:[%s4275_s17 + $0xa] sm:$0x7f]  ;;  %v2989_v48 = vld [vmem:[%s4275_s17 + $0x18] sm:$0xff] }
  0x32   : >> { %v2963_v37 = vld [vmem:[%s5023_s2 + $0x4] sm:$0x3]  ;;  %v2993_v44 = vld [vmem:[%s5023_s2 + $0x6] sm:$0x3]  ;;  %v4033_v47 = vld [vmem:[%s5024_s3 + $0x88] sm:$0xff]  }
  0x33   : >> { %v644_v39 = vsel %vm422_vm0, %v2963_v37, 0  ;;  %v632_v41 = vld [vmem:[%s4275_s17 + $0x2] sm:$0xff]  ;;  %v813_v46 = vsel %vm422_vm0, %v2993_v44, 0  ;;  %v636_v52 = vld [vmem:[%s4324_s15 + $0xa] sm:$0x7f]  ;;  %v4035_v54 = vld [vmem:[%s5024_s3 + $0xf8] sm:$0xff]  }
  0x34   : >> { %3573 = vmatpush3.bf16.msra.mxu0 %v4014_v14  ;;  %v634_v45 = vpack.c.bf16 %v633_v42, %v632_v41  ;;  %v4034_v49 = vld [vmem:[%s5024_s3 + $0x80] sm:$0xff]   ;;  %v4037_v56 = vld [vmem:[%s5024_s3 + $0x138] sm:$0xff]   ;;  %v4036_v57 = vld [vmem:[%s5024_s3 + $0xf0] sm:$0xff]  }
  0x35   : >> { %3574 = vmatprep.subr.bf16.mxu0 %v4180_v2  ;;  %3595 = vmatmul.mubr.msk.bf16.vlgmr.msra.gmra.mxu1 %vm418_vm2, %v469_v15  ;;  %v2990_v50 = vld [vmem:[%s4275_s17 + $0x20] sm:$0x7f]  ;;  %v4039_v58 = vld [vmem:[%s5024_s3 + $0x130] sm:$0xff]   ;;  %v4038_v59 = vld [vmem:[%s5024_s3 + $0xe8] sm:$0xff]  }
  0x36   : >> { %3599 = vmatpush3.bf16.msra.mxu1 %v4015_v16  ;;  %3614 = vmatprep.mubr.msk.bf16.mxu1 %vm4181_vm1, %v4180_v2  ;;  %v635_v51 = vld [vmem:[%s4324_s15 + $0x2] sm:$0xff]  ;;  %v802_v53 = vpack.c.bf16 %v2990_v50, %v2989_v48  ;;  %v4042_v63 = vld [vmem:[%s5024_s3 + $0xd8] sm:$0xff]   ;;  %v4044_v1 = vld [vmem:[%s5024_s3 + $0xd0] sm:$0xff]  }
  0x37   : >> { %3600 = vmatprep.subr.bf16.mxu1 %v4180_v2  ;;  %v637_v55 = vpack.c.bf16 %v636_v52, %v635_v51  ;;  %v4041_v60 = vld [vmem:[%s5024_s3 + $0x128] sm:$0xff]   ;;  %v4040_v61 = vld [vmem:[%s5024_s3 + $0xe0] sm:$0xff]   ;;  %v4045_v0 = vld [vmem:[%s5024_s3 + $0x118] sm:$0xff]  }
  0x38   : >> { %3575 = vmatpush3.bf16.msra.mxu0 %v4016_v17  ;;  %v4043_v62 = vld [vmem:[%s5024_s3 + $0x120] sm:$0xff]   ;;  %v4047_v3 = vld [vmem:[%s5024_s3 + $0x110] sm:$0xff]   ;;  %v4046_v4 = vld [vmem:[%s5024_s3 + $0xc8] sm:$0xff]  }
  0x39   : >> { %3576 = vmatprep.subr.bf16.mxu0 %v4180_v2  ;;  %v4049_v5 = vld [vmem:[%s5024_s3 + $0x108] sm:$0xff]   ;;  %v4048_v6 = vld [vmem:[%s5024_s3 + $0xc0] sm:$0xff]   ;;  %v2991_v7 = vld [vmem:[%s4324_s15 + $0x18] sm:$0xff] }
  0x3a   : >> { %3601 = vmatpush3.bf16.msra.mxu1 %v4017_v18  ;;  %v2992_v8 = vld [vmem:[%s4324_s15 + $0x20] sm:$0x7f]  ;;  %v3023_v12 = vld [vmem:[%s5023_s2 + $0x8] sm:$0x3]  ;;  %v3083_v15 = vld [vmem:[%s5023_s2 + $0xc] sm:$0x3] }
  0x3b   : >> { %3602 = vmatprep.subr.bf16.mxu1 %v4180_v2  ;;  %v4050_v9 = vld [vmem:[%s5024_s3 + $0x100] sm:$0xff]   ;;  %v806_v13 = vpack.c.bf16 %v2992_v8, %v2991_v7  ;;  %v978_v16 = vsel %vm422_vm0, %v3023_v12, 0  ;;  %v1312_v17 = vsel %vm422_vm0, %v3083_v15, 0  ;;  %v4056_v35 = vld [vmem:[%s5024_s3 + $0x168] sm:$0xff]   ;;  %v4062_v41 = vld [vmem:[%s5024_s3 + $0x150] sm:$0xff]  }
  0x3c   : >> { %3577 = vmatpush3.bf16.msra.mxu0 %v4018_v19  ;;  %v3021_v10 = vld [vmem:[%s4324_s15 + $0x19] sm:$0xff]  ;;  %v3022_v11 = vld [vmem:[%s4324_s15 + $0x21] sm:$0x7f]  ;;  %v3113_v52 = vld [vmem:[%s5023_s2 + $0xe] sm:$0x3] }
  0x3d   : >> { %3578 = vmatprep.subr.bf16.mxu0 %v4180_v2  ;;  %v971_v14 = vpack.c.bf16 %v3022_v11, %v3021_v10  ;;  %v3019_v18 = vld [vmem:[%s4275_s17 + $0x19] sm:$0xff]  ;;  %v3020_v19 = vld [vmem:[%s4275_s17 + $0x21] sm:$0x7f]  ;;  %v4077_v7 = vld [vmem:[%s5024_s3 + $0x210] sm:$0xff]  }
  0x3e   : >> { %3603 = vmatpush3.bf16.msra.mxu1 %v4019_v20  ;;  %v3079_v20 = vld [vmem:[%s4275_s17 + $0x30] sm:$0xff]  ;;  %v4057_v34 = vld [vmem:[%s5024_s3 + $0x1a0] sm:$0xff]   ;;  %v3082_v44 = vld [vmem:[%s4324_s15 + $0x38] sm:$0x7f] }
  0x3f   : >> { %3604 = vmatprep.subr.bf16.mxu1 %v4180_v2  ;;  %v4058_v37 = vld [vmem:[%s5024_s3 + $0x160] sm:$0xff]   ;;  %v4076_v8 = vld [vmem:[%s5024_s3 + $0x1d8] sm:$0xff]   ;;  %v4078_v10 = vld [vmem:[%s5024_s3 + $0x1d0] sm:$0xff]  }
  0x40   : >> { %3579 = vmatpush3.bf16.msra.mxu0 %v4020_v21  ;;  %v3080_v21 = vld [vmem:[%s4275_s17 + $0x38] sm:$0x7f]  ;;  %v4065_v42 = vld [vmem:[%s5024_s3 + $0x180] sm:$0xff]  }
  0x41   : >> { %3580 = vmatprep.subr.bf16.mxu0 %v4180_v2  ;;  %v1301_v24 = vpack.c.bf16 %v3080_v21, %v3079_v20  ;;  %v3051_v50 = vld [vmem:[%s4324_s15 + $0x1a] sm:$0xff]  ;;  %v3052_v51 = vld [vmem:[%s4324_s15 + $0x22] sm:$0x7f]  ;;  %v3141_v12 = vld [vmem:[%s4324_s15 + $0x32] sm:$0xff] }
  0x42   : >> { %3605 = vmatpush3.bf16.msra.mxu1 %v4021_v22  ;;  %v3053_v22 = vld [vmem:[%s5023_s2 + $0xa] sm:$0x3]  ;;  %v4081_v11 = vld [vmem:[%s5024_s3 + $0x200] sm:$0xff]  }
  0x43   : >> { %3606 = vmatprep.subr.bf16.mxu1 %v4180_v2  ;;  %v1143_v25 = vsel %vm422_vm0, %v3053_v22, 0 }
  0x44   : >> { %3581 = vmatpush3.bf16.msra.mxu0 %v4022_v23  ;;  %v968_v23 = vpack.c.bf16 %v3020_v19, %v3019_v18  ;;  %v3112_v18 = vld [vmem:[%s4324_s15 + $0x39] sm:$0x7f] }
  0x45   : >> { %3624 = vmatprep.subr.bf16.mxu0 %v4180_v2 }
  0x46   : >> { %3607 = vmatpush3.bf16.msra.mxu1 %v4023_v26  ;;  %v4051_v26 = vld [vmem:[%s5024_s3 + $0x1b8] sm:$0xff]  }
  0x47   : >> { %3583 = vmatmul.mubr.bf16.vlgmr.msra.gmra.mxu0 %v311_v27  ;;  %3608 = vmatprep.subr.bf16.mxu1 %v4180_v2  ;;  %v3049_v27 = vld [vmem:[%s4275_s17 + $0x1a] sm:$0xff] }
  0x48   : >> { %3625 = vmatpush3.bf16.msra.mxu0 %v4024_v28  ;;  %3640 = vmatprep.mubr.msk.bf16.mxu0 %vm4181_vm1, %v4180_v2  ;;  %v3050_v28 = vld [vmem:[%s4275_s17 + $0x22] sm:$0x7f] }
  0x49   : >> { %3626 = vmatprep.subr.bf16.mxu0 %v4180_v2 }
  0x4a   : >> { %3609 = vmatpush3.bf16.msra.mxu1 %v4025_v29  ;;  %v4053_v29 = vld [vmem:[%s5024_s3 + $0x1b0] sm:$0xff]  }
  0x4b   : >> { %3610 = vmatprep.subr.bf16.mxu1 %v4180_v2 }
  0x4c   : >> { %3627 = vmatpush3.bf16.msra.mxu0 %v4026_v30  ;;  %v1133_v30 = vpack.c.bf16 %v3050_v28, %v3049_v27 }
  0x4d   : >> { %3628 = vmatprep.subr.bf16.mxu0 %v4180_v2 }
  0x4e   : >> { %3611 = vmatpush3.bf16.msra.mxu1 %v4027_v31  ;;  %v4052_v31 = vld [vmem:[%s5024_s3 + $0x178] sm:$0xff]  }
  0x4f   : >> { %3612 = vmatprep.subr.bf16.mxu1 %v4180_v2 }
  0x50   : >> { %3629 = vmatpush3.bf16.msra.mxu0 %v4028_v32  ;;  %v4055_v32 = vld [vmem:[%s5024_s3 + $0x1a8] sm:$0xff]  }
  0x51   : >> { %3630 = vmatprep.subr.bf16.mxu0 %v4180_v2 }
  0x52   : >> { %3613 = vmatpush3.bf16.msra.mxu1 %v4029_v33  ;;  %v4054_v33 = vld [vmem:[%s5024_s3 + $0x170] sm:$0xff]  }
  0x53   : >> { %3618 = vmatprep.subr.bf16.mxu1 %v4180_v2 }
  0x54   : >> { %3631 = vmatpush3.bf16.msra.mxu0 %v4030_v36  ;;  %v4059_v36 = vld [vmem:[%s5024_s3 + $0x198] sm:$0xff]  }
  0x55   : >> { %3632 = vmatprep.subr.bf16.mxu0 %v4180_v2  ;;  %3615 = vmatmul.mubr.bf16.vlgmr.msra.gmra.mxu1 %v472_v38  ;;  %v4061_v38 = vld [vmem:[%s5024_s3 + $0x190] sm:$0xff]  }
  0x56   : >> { %3619 = vmatpush3.bf16.msra.mxu1 %v644_v39  ;;  %3620 = vmatprep.mubr.msk.bf16.mxu1 %vm4181_vm1, %v4180_v2  ;;  %v4060_v39 = vld [vmem:[%s5024_s3 + $0x158] sm:$0xff]  }
  0x57   : >> { %3644 = vmatprep.subr.bf16.mxu1 %v4180_v2 }
  0x58   : >> { %3633 = vmatpush3.bf16.msra.mxu0 %v4031_v40  ;;  %v4063_v40 = vld [vmem:[%s5024_s3 + $0x188] sm:$0xff]  }
  0x59   : >> { %3634 = vmatprep.subr.bf16.mxu0 %v4180_v2 }
  0x5c   : >> { %3635 = vmatpush3.bf16.msra.mxu0 %v4032_v43  ;;  %v3081_v43 = vld [vmem:[%s4324_s15 + $0x30] sm:$0xff] }
  0x5d   : >> { %3636 = vmatprep.subr.bf16.mxu0 %v4180_v2  ;;  %3621 = vmatmul.mubr.msk.bf16.vlgmr.msra.gmra.mxu1 %vm418_vm2, %v634_v45  ;;  %v4064_v45 = vld [vmem:[%s5024_s3 + $0x148] sm:$0xff]  }
  0x5e   : >> { %3645 = vmatpush3.bf16.msra.mxu1 %v813_v46  ;;  %3646 = vmatprep.mubr.msk.bf16.mxu1 %vm4181_vm1, %v4180_v2  ;;  %v3143_v46 = vld [vmem:[%s5023_s2 + $0x10] sm:$0x3] }
  0x5f   : >> { %3650 = vmatprep.subr.bf16.mxu1 %v4180_v2  ;;  %v1642_v48 = vsel %vm422_vm0, %v3143_v46, 0 }
  0x60   : >> { %3637 = vmatpush3.bf16.msra.mxu0 %v4033_v47  ;;  %v1305_v47 = vpack.c.bf16 %v3082_v44, %v3081_v43 }
  0x61   : >> { %3638 = vmatprep.subr.bf16.mxu0 %v4180_v2 }
  0x64   : >> { %3639 = vmatpush3.bf16.msra.mxu0 %v4034_v49  ;;  %v4066_v49 = vld [vmem:[%s5024_s3 + $0x140] sm:$0xff]  }
  0x65   : >> { %3676 = vmatprep.subr.bf16.mxu0 %v4180_v2  ;;  %3647 = vmatmul.mubr.msk.bf16.vlgmr.msra.gmra.mxu1 %vm418_vm2, %v802_v53  ;;  %v3139_v53 = vld [vmem:[%s4275_s17 + $0x32] sm:$0xff] }
  0x66   : >> { %3651 = vmatpush3.bf16.msra.mxu1 %v4035_v54  ;;  %3666 = vmatprep.mubr.msk.bf16.mxu1 %vm4181_vm1, %v4180_v2  ;;  %v3140_v54 = vld [vmem:[%s4275_s17 + $0x3a] sm:$0x7f] }
  0x67   : >> { %3641 = vmatmul.mubr.bf16.vlgmr.msra.gmra.mxu0 %v637_v55  ;;  %3652 = vmatprep.subr.bf16.mxu1 %v4180_v2  ;;  %v1136_v55 = vpack.c.bf16 %v3052_v51, %v3051_v50 }
  0x68   : >> { %3677 = vmatpush3.bf16.msra.mxu0 %v4037_v56  ;;  %3692 = vmatprep.mubr.msk.bf16.mxu0 %vm4181_vm1, %v4180_v2  ;;  %v1477_v56 = vsel %vm422_vm0, %v3113_v52, 0 }
  0x69   : >> { %3678 = vmatprep.subr.bf16.mxu0 %v4180_v2 }
  0x6a   : >> { %3653 = vmatpush3.bf16.msra.mxu1 %v4036_v57  ;;  %v1632_v57 = vpack.c.bf16 %v3140_v54, %v3139_v53 }
  0x6b   : >> { %3654 = vmatprep.subr.bf16.mxu1 %v4180_v2 }
  0x6c   : >> { %3679 = vmatpush3.bf16.msra.mxu0 %v4039_v58  ;;  %v4067_v58 = vld [vmem:[%s5024_s3 + $0x238] sm:$0xff]  }
  0x6d   : >> { %3680 = vmatprep.subr.bf16.mxu0 %v4180_v2 }
  0x6e   : >> { %3655 = vmatpush3.bf16.msra.mxu1 %v4038_v59  ;;  %v3109_v59 = vld [vmem:[%s4275_s17 + $0x31] sm:$0xff] }
  0x6f   : >> { %3656 = vmatprep.subr.bf16.mxu1 %v4180_v2 }
  0x70   : >> { %3681 = vmatpush3.bf16.msra.mxu0 %v4041_v60  ;;  %v3110_v60 = vld [vmem:[%s4275_s17 + $0x39] sm:$0x7f] }
  0x71   : >> { %3682 = vmatprep.subr.bf16.mxu0 %v4180_v2 }
  0x72   : >> { %3657 = vmatpush3.bf16.msra.mxu1 %v4040_v61  ;;  %v4069_v61 = vld [vmem:[%s5024_s3 + $0x230] sm:$0xff]  }
  0x73   : >> { %3658 = vmatprep.subr.bf16.mxu1 %v4180_v2 }
  0x74   : >> { %3683 = vmatpush3.bf16.msra.mxu0 %v4043_v62  ;;  %v1467_v62 = vpack.c.bf16 %v3110_v60, %v3109_v59 }
  0x75   : >> { %3684 = vmatprep.subr.bf16.mxu0 %v4180_v2 }
  0x76   : >> { %3659 = vmatpush3.bf16.msra.mxu1 %v4042_v63  ;;  %v4068_v63 = vld [vmem:[%s5024_s3 + $0x1f8] sm:$0xff]  }
  0x77   : >> { %3660 = vmatprep.subr.bf16.mxu1 %v4180_v2 }
  0x78   : >> { %3685 = vmatpush3.bf16.msra.mxu0 %v4045_v0  ;;  %v4071_v0 = vld [vmem:[%s5024_s3 + $0x228] sm:$0xff]  }
  0x79   : >> { %3686 = vmatprep.subr.bf16.mxu0 %v4180_v2 }
  0x7a   : >> { %3661 = vmatpush3.bf16.msra.mxu1 %v4044_v1  ;;  %v4070_v1 = vld [vmem:[%s5024_s3 + $0x1f0] sm:$0xff]  }
  0x7b   : >> { %3662 = vmatprep.subr.bf16.mxu1 %v4180_v2 }
  0x7c   : >> { %3687 = vmatpush3.bf16.msra.mxu0 %v4047_v3  ;;  %v4073_v3 = vld [vmem:[%s5024_s3 + $0x220] sm:$0xff]  }
  0x7d   : >> { %3688 = vmatprep.subr.bf16.mxu0 %v4180_v2 }
  0x7e   : >> { %3663 = vmatpush3.bf16.msra.mxu1 %v4046_v4  ;;  %v4072_v4 = vld [vmem:[%s5024_s3 + $0x1e8] sm:$0xff]  }
  0x7f   : >> { %3664 = vmatprep.subr.bf16.mxu1 %v4180_v2 }
  0x80   : >> { %3689 = vmatpush3.bf16.msra.mxu0 %v4049_v5  ;;  %v4075_v5 = vld [vmem:[%s5024_s3 + $0x218] sm:$0xff]  }
  0x81   : >> { %3690 = vmatprep.subr.bf16.mxu0 %v4180_v2 }
  0x82   : >> { %3665 = vmatpush3.bf16.msra.mxu1 %v4048_v6  ;;  %v4074_v6 = vld [vmem:[%s5024_s3 + $0x1e0] sm:$0xff]  }
  0x83   : >> { %3670 = vmatprep.subr.bf16.mxu1 %v4180_v2 }
  0x84   : >> { %3691 = vmatpush3.bf16.msra.mxu0 %v4050_v9  ;;  %v4079_v9 = vld [vmem:[%s5024_s3 + $0x208] sm:$0xff]  }
  0x85   : >> { %3722 = vmatprep.subr.bf16.mxu0 %v4180_v2  ;;  %3667 = vmatmul.mubr.bf16.vlgmr.msra.gmra.mxu1 %v806_v13  ;;  %v3142_v13 = vld [vmem:[%s4324_s15 + $0x3a] sm:$0x7f] }
  0x86   : >> { %3671 = vmatpush3.bf16.msra.mxu1 %v978_v16  ;;  %3672 = vmatprep.mubr.msk.bf16.mxu1 %vm4181_vm1, %v4180_v2  ;;  %v1635_v15 = vpack.c.bf16 %v3142_v13, %v3141_v12  ;;  %v4082_v16 = vld [vmem:[%s5024_s3 + $0x1c0] sm:$0xff]  }
  0x87   : >> { %3693 = vmatmul.mubr.bf16.vlgmr.msra.gmra.mxu0 %v971_v14  ;;  %3696 = vmatprep.subr.bf16.mxu1 %v4180_v2  ;;  %v4080_v14 = vld [vmem:[%s5024_s3 + $0x1c8] sm:$0xff]  }
  0x88   : >> { %3723 = vmatpush3.bf16.msra.mxu0 %v1312_v17  ;;  %3724 = vmatprep.mubr.msk.bf16.mxu0 %vm4181_vm1, %v4180_v2  ;;  %v3111_v17 = vld [vmem:[%s4324_s15 + $0x31] sm:$0xff]  ;;  %s2868_s15 = scalar_lea.vmem [#allocation2], %s4265_s14 }
  0x89   : >> { %3728 = vmatprep.subr.bf16.mxu0 %v4180_v2  ;;  %v1470_v19 = vpack.c.bf16 %v3112_v18, %v3111_v17 }
  0x8d   : >> { %3673 = vmatmul.mubr.msk.bf16.vlgmr.msra.gmra.mxu1 %vm418_vm2, %v968_v23 }
  0x8e   : >> { %3697 = vmatpush3.bf16.msra.mxu1 %v1143_v25  ;;  %3698 = vmatprep.mubr.msk.bf16.mxu1 %vm4181_vm1, %v4180_v2 }
  0x8f   : >> { %3725 = vmatmul.mubr.msk.bf16.vlgmr.msra.gmra.mxu0 %vm418_vm2, %v1301_v24  ;;  %3702 = vmatprep.subr.bf16.mxu1 %v4180_v2 }
  0x90   : >> { %3729 = vmatpush3.bf16.msra.mxu0 %v4051_v26  ;;  %3744 = vmatprep.mubr.msk.bf16.mxu0 %vm4181_vm1, %v4180_v2 }
  0x91   : >> { %3730 = vmatprep.subr.bf16.mxu0 %v4180_v2 }
  0x94   : >> { %3731 = vmatpush3.bf16.msra.mxu0 %v4053_v29 }
  0x95   : >> { %3699 = vmatmul.mubr.msk.bf16.vlgmr.msra.gmra.mxu1 %vm418_vm2, %v1133_v30  ;;  %3732 = vmatprep.subr.bf16.mxu0 %v4180_v2 }
  0x96   : >> { %3703 = vmatpush3.bf16.msra.mxu1 %v4052_v31  ;;  %3718 = vmatprep.mubr.msk.bf16.mxu1 %vm4181_vm1, %v4180_v2 }
  0x97   : >> { %3704 = vmatprep.subr.bf16.mxu1 %v4180_v2 }
  0x98   : >> { %3733 = vmatpush3.bf16.msra.mxu0 %v4055_v32 }
  0x99   : >> { %3734 = vmatprep.subr.bf16.mxu0 %v4180_v2 }
  0x9a   : >> { %3705 = vmatpush3.bf16.msra.mxu1 %v4054_v33 }
  0x9b   : >> { %3706 = vmatprep.subr.bf16.mxu1 %v4180_v2 }
  0x9c   : >> { %3735 = vmatpush3.bf16.msra.mxu0 %v4057_v34 }
  0x9d   : >> { %3736 = vmatprep.subr.bf16.mxu0 %v4180_v2 }
  0x9e   : >> { %3707 = vmatpush3.bf16.msra.mxu1 %v4056_v35 }
  0x9f   : >> { %3708 = vmatprep.subr.bf16.mxu1 %v4180_v2 }
  0xa0   : >> { %3737 = vmatpush3.bf16.msra.mxu0 %v4059_v36 }
  0xa1   : >> { %3738 = vmatprep.subr.bf16.mxu0 %v4180_v2 }
  0xa2   : >> { %3709 = vmatpush3.bf16.msra.mxu1 %v4058_v37 }
  0xa3   : >> { %3710 = vmatprep.subr.bf16.mxu1 %v4180_v2 }
  0xa4   : >> { %3739 = vmatpush3.bf16.msra.mxu0 %v4061_v38 }
  0xa5   : >> { %3740 = vmatprep.subr.bf16.mxu0 %v4180_v2 }
  0xa6   : >> { %3711 = vmatpush3.bf16.msra.mxu1 %v4060_v39 }
  0xa7   : >> { %3712 = vmatprep.subr.bf16.mxu1 %v4180_v2 }
  0xa8   : >> { %3741 = vmatpush3.bf16.msra.mxu0 %v4063_v40 }
  0xa9   : >> { %3742 = vmatprep.subr.bf16.mxu0 %v4180_v2 }
  0xaa   : >> { %3713 = vmatpush3.bf16.msra.mxu1 %v4062_v41 }
  0xab   : >> { %3714 = vmatprep.subr.bf16.mxu1 %v4180_v2 }
  0xac   : >> { %3743 = vmatpush3.bf16.msra.mxu0 %v4065_v42 }
  0xad   : >> { %3774 = vmatprep.subr.bf16.mxu0 %v4180_v2 }
  0xae   : >> { %3715 = vmatpush3.bf16.msra.mxu1 %v4064_v45 }
  0xaf   : >> { %3716 = vmatprep.subr.bf16.mxu1 %v4180_v2  ;;  %3745 = vmatmul.mubr.bf16.vlgmr.msra.gmra.mxu0 %v1305_v47 }
  0xb0   : >> { %3775 = vmatpush3.bf16.msra.mxu0 %v1642_v48  ;;  %3776 = vmatprep.mubr.msk.bf16.mxu0 %vm4181_vm1, %v4180_v2 }
  0xb1   : >> { %3780 = vmatprep.subr.bf16.mxu0 %v4180_v2 }
  0xb2   : >> { %3717 = vmatpush3.bf16.msra.mxu1 %v4066_v49 }
  0xb3   : >> { %3748 = vmatprep.subr.bf16.mxu1 %v4180_v2 }
  0xb5   : >> { %3719 = vmatmul.mubr.bf16.vlgmr.msra.gmra.mxu1 %v1136_v55 }
  0xb6   : >> { %3749 = vmatpush3.bf16.msra.mxu1 %v1477_v56  ;;  %3750 = vmatprep.mubr.msk.bf16.mxu1 %vm4181_vm1, %v4180_v2 }
  0xb7   : >> { %3754 = vmatprep.subr.bf16.mxu1 %v4180_v2  ;;  %3777 = vmatmul.mubr.msk.bf16.vlgmr.msra.gmra.mxu0 %vm418_vm2, %v1632_v57 }
  0xb8   : >> { %3781 = vmatpush3.bf16.msra.mxu0 %v4067_v58  ;;  %3796 = vmatprep.mubr.msk.bf16.mxu0 %vm4181_vm1, %v4180_v2 }
  0xb9   : >> { %3782 = vmatprep.subr.bf16.mxu0 %v4180_v2 }
  0xbc   : >> { %3783 = vmatpush3.bf16.msra.mxu0 %v4069_v61 }
  0xbd   : >> { %3751 = vmatmul.mubr.msk.bf16.vlgmr.msra.gmra.mxu1 %vm418_vm2, %v1467_v62  ;;  %3784 = vmatprep.subr.bf16.mxu0 %v4180_v2 }
  0xbe   : >> { %3755 = vmatpush3.bf16.msra.mxu1 %v4068_v63  ;;  %3770 = vmatprep.mubr.msk.bf16.mxu1 %vm4181_vm1, %v4180_v2 }
  0xbf   : >> { %3756 = vmatprep.subr.bf16.mxu1 %v4180_v2 }
  0xc0   : >> { %3785 = vmatpush3.bf16.msra.mxu0 %v4071_v0 }
  0xc1   : >> { %3786 = vmatprep.subr.bf16.mxu0 %v4180_v2 }
  0xc2   : >> { %3757 = vmatpush3.bf16.msra.mxu1 %v4070_v1 }
  0xc3   : >> { %3758 = vmatprep.subr.bf16.mxu1 %v4180_v2 }
  0xc4   : >> { %3787 = vmatpush3.bf16.msra.mxu0 %v4073_v3 }
  0xc5   : >> { %3788 = vmatprep.subr.bf16.mxu0 %v4180_v2 }
  0xc6   : >> { %3759 = vmatpush3.bf16.msra.mxu1 %v4072_v4 }
  0xc7   : >> { %3760 = vmatprep.subr.bf16.mxu1 %v4180_v2 }
  0xc8   : >> { %3789 = vmatpush3.bf16.msra.mxu0 %v4075_v5 }
  0xc9   : >> { %3790 = vmatprep.subr.bf16.mxu0 %v4180_v2 }
  0xca   : >> { %3761 = vmatpush3.bf16.msra.mxu1 %v4074_v6 }
  0xcb   : >> { %3762 = vmatprep.subr.bf16.mxu1 %v4180_v2 }
  0xcc   : >> { %3791 = vmatpush3.bf16.msra.mxu0 %v4077_v7 }
  0xcd   : >> { %3792 = vmatprep.subr.bf16.mxu0 %v4180_v2 }
  0xce   : >> { %3763 = vmatpush3.bf16.msra.mxu1 %v4076_v8 }
  0xcf   : >> { %3764 = vmatprep.subr.bf16.mxu1 %v4180_v2 }
  0xd0   : >> { %3793 = vmatpush3.bf16.msra.mxu0 %v4079_v9 }
  0xd1   : >> { %3794 = vmatprep.subr.bf16.mxu0 %v4180_v2 }
  0xd2   : >> { %3765 = vmatpush3.bf16.msra.mxu1 %v4078_v10 }
  0xd3   : >> { %3766 = vmatprep.subr.bf16.mxu1 %v4180_v2 }
  0xd4   : >> { %3795 = vmatpush3.bf16.msra.mxu0 %v4081_v11 }
  0xd6   : >> { %3767 = vmatpush3.bf16.msra.mxu1 %v4080_v14 }
  0xd7   : >> { %3768 = vmatprep.subr.bf16.mxu1 %v4180_v2  ;;  %3797 = vmatmul.mubr.bf16.vlgmr.msra.gmra.mxu0 %v1635_v15 }
  0xda   : >> { %3769 = vmatpush3.bf16.msra.mxu1 %v4082_v16 }
  0xdd   : >> { %3771 = vmatmul.mubr.bf16.vlgmr.msra.gmra.mxu1 %v1470_v19 }
  0xed   : >> { %v460_v20 = vpop.f32.mrf.mxu1 }
  0xef   : >> { %v3590_v21 = vpop.f32.mrf.mxu1 }
  0xf1   : >> { %v463_v22 = vpop.f32.mrf.mxu1 }
  0xf3   : >> { %v3591_v23 = vpop.f32.mrf.mxu1 }
  0xf5   : >> { %v515_v24 = vpop.f32.mrf.mxu1 }
  0xf7   : >> { %v3596_v25 = vpop.f32.mrf.mxu1 }
  0xf9   : >> { %v518_v26 = vpop.f32.mrf.mxu1 }
  0xfb   : >> { %v3597_v27 = vpop.f32.mrf.mxu1 }
 0x107   : >> { %v411_v28 = vpop.f32.mrf.mxu0 }
 0x108   : >> { %v461_v29 = vadd.f32 %v460_v20, %v411_v28 }
 0x109   : >> { %v3584_v30 = vpop.f32.mrf.mxu0 }
 0x10a   : >> { %v522_v31 = vadd.f32 %v515_v24, %v461_v29 }
 0x10b   : >> { %v414_v32 = vpop.f32.mrf.mxu0 }
 0x10c   : >> { %v464_v33 = vadd.f32 %v463_v22, %v414_v32 }
 0x10d   : >> { %v3585_v34 = vpop.f32.mrf.mxu0 }
 0x10e   : >> { %v523_v2 = vadd.f32 %v518_v26, %v464_v33 }
 0x115   : >> { %v623_v35 = vpop.f32.mrf.mxu1 }
 0x116   : >> { %v630_v36 = vadd.f32 %v623_v35, %v522_v31 }
 0x117   : >> { %v3616_v37 = vpop.f32.mrf.mxu1 }
 0x119   : >> { %v626_v38 = vpop.f32.mrf.mxu1 }
 0x11a   : >> { %v631_v39 = vadd.f32 %v626_v38, %v523_v2 }
 0x11b   : >> { %v3617_v40 = vpop.f32.mrf.mxu1 }
 0x11d   : >> { %v680_v41 = vpop.f32.mrf.mxu1 }
 0x11e   : >> { %v687_v42 = vadd.f32 %v680_v41, %v630_v36 }
 0x11f   : >> { %v3622_v43 = vpop.f32.mrf.mxu1 }
 0x121   : >> { %v683_v44 = vpop.f32.mrf.mxu1 }
 0x122   : >> { %v688_v45 = vadd.f32 %v683_v44, %v631_v39 }
 0x123   : >> { %v3623_v46 = vpop.f32.mrf.mxu1 }
 0x125   : >> { %v849_v47 = vpop.f32.mrf.mxu1 }
 0x127   : >> { %v788_v48 = vpop.f32.mrf.mxu0  ;;  %v3648_v49 = vpop.f32.mrf.mxu1 }
 0x128   : >> { %v795_v50 = vadd.f32 %v788_v48, %v687_v42 }
 0x129   : >> { %v3642_v51 = vpop.f32.mrf.mxu0  ;;  %v852_v52 = vpop.f32.mrf.mxu1 }
 0x12a   : >> { %v856_v53 = vadd.f32 %v849_v47, %v795_v50 }
 0x12b   : >> { %v791_v54 = vpop.f32.mrf.mxu0  ;;  %v3649_v55 = vpop.f32.mrf.mxu1 }
 0x12c   : >> { %v796_v56 = vadd.f32 %v791_v54, %v688_v45 }
 0x12d   : >> { %v3643_v57 = vpop.f32.mrf.mxu0 }
 0x12e   : >> { %v857_v58 = vadd.f32 %v852_v52, %v796_v56 }
 0x145   : >> { %v957_v59 = vpop.f32.mrf.mxu1 }
 0x146   : >> { %v964_v60 = vadd.f32 %v957_v59, %v856_v53 }
 0x147   : >> { %v1122_v61 = vpop.f32.mrf.mxu0  ;;  %v3668_v62 = vpop.f32.mrf.mxu1 }
 0x149   : >> { %v3694_v63 = vpop.f32.mrf.mxu0  ;;  %v960_v0 = vpop.f32.mrf.mxu1 }
 0x14a   : >> { %v965_v1 = vadd.f32 %v960_v0, %v857_v58 }
 0x14b   : >> { %v1125_v3 = vpop.f32.mrf.mxu0  ;;  %v3669_v4 = vpop.f32.mrf.mxu1 }
 0x14d   : >> { %v3695_v5 = vpop.f32.mrf.mxu0  ;;  %v1014_v6 = vpop.f32.mrf.mxu1 }
 0x14e   : >> { %v1021_v7 = vadd.f32 %v1014_v6, %v964_v60 }
 0x14f   : >> { %v1348_v8 = vpop.f32.mrf.mxu0  ;;  %v3674_v9 = vpop.f32.mrf.mxu1 }
 0x150   : >> { %v1129_v10 = vadd.f32 %v1122_v61, %v1021_v7 }
 0x151   : >> { %v3726_v11 = vpop.f32.mrf.mxu0  ;;  %v1017_v12 = vpop.f32.mrf.mxu1 }
 0x152   : >> { %v1022_v13 = vadd.f32 %v1017_v12, %v965_v1 }
 0x153   : >> { %v1351_v14 = vpop.f32.mrf.mxu0  ;;  %v3675_v15 = vpop.f32.mrf.mxu1 }
 0x154   : >> { %v1130_v16 = vadd.f32 %v1125_v3, %v1022_v13 }
 0x155   : >> { %v3727_v17 = vpop.f32.mrf.mxu0  ;;  %v1179_v18 = vpop.f32.mrf.mxu1 }
 0x156   : >> { %v1186_v25 = vadd.f32 %v1179_v18, %v1129_v10 }
 0x157   : >> { %v3700_v19 = vpop.f32.mrf.mxu1 }
 0x159   : >> { %v1182_v20 = vpop.f32.mrf.mxu1 }
 0x15a   : >> { %v1187_v31 = vadd.f32 %v1182_v20, %v1130_v16 }
 0x15b   : >> { %v3701_v21 = vpop.f32.mrf.mxu1 }
 0x16f   : >> { %v1456_v22 = vpop.f32.mrf.mxu0 }
 0x171   : >> { %v3746_v23 = vpop.f32.mrf.mxu0 }
 0x173   : >> { %v1459_v24 = vpop.f32.mrf.mxu0 }
 0x175   : >> { %v1287_v26 = vpop.f32.mrf.mxu1  ;;  %v3747_v27 = vpop.f32.mrf.mxu0 }
 0x176   : >> { %v1294_v28 = vadd.f32 %v1287_v26, %v1186_v25 }
 0x177   : >> { %v3720_v29 = vpop.f32.mrf.mxu1  ;;  %v1678_v30 = vpop.f32.mrf.mxu0 }
 0x178   : >> { %v1355_v32 = vadd.f32 %v1348_v8, %v1294_v28 }
 0x179   : >> { %v1290_v33 = vpop.f32.mrf.mxu1  ;;  %v3778_v34 = vpop.f32.mrf.mxu0 }
 0x17a   : >> { %v1295_v2 = vadd.f32 %v1290_v33, %v1187_v31  ;;  %v1463_v45 = vadd.f32 %v1456_v22, %v1355_v32 }
 0x17b   : >> { %v3721_v35 = vpop.f32.mrf.mxu1  ;;  %v1681_v36 = vpop.f32.mrf.mxu0 }
 0x17c   : >> { %v1356_v37 = vadd.f32 %v1351_v14, %v1295_v2 }
 0x17d   : >> { %v1513_v38 = vpop.f32.mrf.mxu1  ;;  %v3779_v39 = vpop.f32.mrf.mxu0 }
 0x17e   : >> { %v1520_v47 = vadd.f32 %v1513_v38, %v1463_v45  ;;  %v1464_v50 = vadd.f32 %v1459_v24, %v1356_v37 }
 0x17f   : >> { %v3752_v40 = vpop.f32.mrf.mxu1 }
 0x181   : >> { %v1516_v41 = vpop.f32.mrf.mxu1 }
 0x182   : >> { %v1521_v53 = vadd.f32 %v1516_v41, %v1464_v50 }
 0x183   : >> { %v3753_v42 = vpop.f32.mrf.mxu1 }
 0x197   : >> { %v1786_v43 = vpop.f32.mrf.mxu0 }
 0x199   : >> { %v3798_v44 = vpop.f32.mrf.mxu0 }
 0x19b   : >> { %v1789_v46 = vpop.f32.mrf.mxu0 }
 0x19d   : >> { %v1621_v48 = vpop.f32.mrf.mxu1  ;;  %v3799_v49 = vpop.f32.mrf.mxu0 }
 0x19e   : >> { %v1628_v51 = vadd.f32 %v1621_v48, %v1520_v47 }
 0x19f   : >> { %v3772_v52 = vpop.f32.mrf.mxu1 }
 0x1a0   : >> { %v1685_v54 = vadd.f32 %v1678_v30, %v1628_v51 }
 0x1a1   : >> { %v1624_v55 = vpop.f32.mrf.mxu1 }
 0x1a2   : >> { %v1793_v56 = vadd.f32 %v1786_v43, %v1685_v54  ;;  %v1629_v57 = vadd.f32 %v1624_v55, %v1521_v53 }
 0x1a3   : >> { %v3773_v58 = vpop.f32.mrf.mxu1 }
 0x1a4   : >> { %v1795_v59 = vmax.f32 %v1793_v56, 0.0  ;;  %v1686_v60 = vadd.f32 %v1681_v36, %v1629_v57 }
 0x1a6   : >> { %3169 = vst [vmem:[%s2868_s15 + $0x19] sm:$0xff] %v1795_v59  ;;  %v1794_v61 = vadd.f32 %v1789_v46, %v1686_v60  ;;  %301 = sbr.rel (!%p299_p4) target bundleno = 38 (0x26), region = 122 }
 0x1a8   : >> { %v1796_v62 = vmax.f32 %v1794_v61, 0.0 }
 0x1aa   : >> { %3170 = vst [vmem:[%s2868_s15 + $0x21] sm:$0x7f] %v1796_v62 }
 0x1ab LB: >> { %v4083_v63 = vld [vmem:[%s5025_s4 + $0x78] sm:$0xff]   ;;  %v4182_v0 = vmov 0.0   ;;  %v4085_v3 = vld [vmem:[%s5025_s4 + $0x70] sm:$0xff]   ;;  %vm4183_vm3 = vmmov 0   ;;  %v4087_v5 = vld [vmem:[%s5025_s4 + $0x68] sm:$0xff]   ;;  %s1806_s13 = smul.u32 24, %s4177_s16  ;;  %s4177_s16 = sphi %s4681_s16, %s1805_s16  }
 0x1ac   : >> { %3800 = vmatprep.subr.bf16.mxu0 %v4182_v0  ;;  %3820 = vmatprep.subr.bf16.mxu1 %v4182_v0  ;;  %v4084_v1 = vld [vmem:[%s5025_s4 + $0x38] sm:$0xff]   ;;  %v4086_v4 = vld [vmem:[%s5025_s4 + $0x30] sm:$0xff]   ;;  %v4088_v6 = vld [vmem:[%s5025_s4 + $0x28] sm:$0xff]  }
 0x1ad   : >> { %3801 = vmatpush3.bf16.msra.mxu0 %v4083_v63  ;;  %3816 = vmatprep.mubr.msk.bf16.mxu0 %vm4183_vm3, %v4182_v0  ;;  %v4089_v7 = vld [vmem:[%s5025_s4 + $0x60] sm:$0xff]   ;;  %v4091_v9 = vld [vmem:[%s5025_s4 + $0x58] sm:$0xff]   ;;  %v4093_v11 = vld [vmem:[%s5025_s4 + $0x50] sm:$0xff]   ;;  %s4750_s24 = scalar_lea.vmem [#allocation2], %s1806_s13 }
 0x1ae   : >> { %3821 = vmatpush3.bf16.msra.mxu1 %v4084_v1  ;;  %3802 = vmatprep.subr.bf16.mxu0 %v4182_v0  ;;  %v4090_v8 = vld [vmem:[%s5025_s4 + $0x20] sm:$0xff]   ;;  %v4092_v10 = vld [vmem:[%s5025_s4 + $0x18] sm:$0xff]   ;;  %v4094_v12 = vld [vmem:[%s5025_s4 + $0x10] sm:$0xff]  }
 0x1af   : >> { %3822 = vmatprep.subr.bf16.mxu1 %v4182_v0  ;;  %3836 = vmatprep.mubr.msk.bf16.mxu1 %vm4183_vm3, %v4182_v0  ;;  %v4095_v13 = vld [vmem:[%s5025_s4 + $0x48] sm:$0xff]   ;;  %v4097_v15 = vld [vmem:[%s5025_s4 + $0x40] sm:$0xff]   ;;  %v4099_v23 = vld [vmem:[%s5025_s4 + $0xb8] sm:$0xff]  }
 0x1b0   : >> { %v4096_v14 = vld [vmem:[%s5025_s4 + $0x8] sm:$0xff]   ;;  %v4098_v17 = vld [vmem:[%s5025_s4] sm:$0xff]   ;;  %v4100_v24 = vld [vmem:[%s5025_s4 + $0xf8] sm:$0xff]  }
 0x1b1   : >> { %3803 = vmatpush3.bf16.msra.mxu0 %v4085_v3  ;;  %v1827_v16 = vld [vmem:[%s4750_s24 + $0x1] sm:$0xff]  ;;  %v1828_v18 = vld [vmem:[%s4750_s24 + $0x9] sm:$0x7f]  ;;  %v4101_v25 = vld [vmem:[%s5025_s4 + $0xb0] sm:$0xff]  }
 0x1b2   : >> { %3823 = vmatpush3.bf16.msra.mxu1 %v4086_v4  ;;  %3804 = vmatprep.subr.bf16.mxu0 %v4182_v0  ;;  %v1808_v19 = vld [vmem:[%s4750_s24] sm:$0xff]  ;;  %v1809_v20 = vld [vmem:[%s4750_s24 + $0x8] sm:$0x7f]  ;;  %v1829_v21 = vpack.c.bf16 %v1828_v18, %v1827_v16  ;;  %v4102_v26 = vld [vmem:[%s5025_s4 + $0xf0] sm:$0xff]  }
 0x1b3   : >> { %3824 = vmatprep.subr.bf16.mxu1 %v4182_v0  ;;  %v1810_v22 = vpack.c.bf16 %v1809_v20, %v1808_v19  ;;  %v4103_v27 = vld [vmem:[%s5025_s4 + $0xa8] sm:$0xff]   ;;  %v4105_v29 = vld [vmem:[%s5025_s4 + $0xa0] sm:$0xff]   ;;  %v4107_v31 = vld [vmem:[%s5025_s4 + $0x98] sm:$0xff]  }
 0x1b4   : >> { %v4104_v28 = vld [vmem:[%s5025_s4 + $0xe8] sm:$0xff]   ;;  %v4106_v30 = vld [vmem:[%s5025_s4 + $0xe0] sm:$0xff]   ;;  %v4108_v32 = vld [vmem:[%s5025_s4 + $0xd8] sm:$0xff]  }
 0x1b5   : >> { %3805 = vmatpush3.bf16.msra.mxu0 %v4087_v5  ;;  %v4109_v33 = vld [vmem:[%s5025_s4 + $0x90] sm:$0xff]   ;;  %v4111_v2 = vld [vmem:[%s5025_s4 + $0x88] sm:$0xff]   ;;  %v4113_v36 = vld [vmem:[%s5025_s4 + $0x80] sm:$0xff]  }
 0x1b6   : >> { %3825 = vmatpush3.bf16.msra.mxu1 %v4088_v6  ;;  %3806 = vmatprep.subr.bf16.mxu0 %v4182_v0  ;;  %v4110_v34 = vld [vmem:[%s5025_s4 + $0xd0] sm:$0xff]   ;;  %v4112_v35 = vld [vmem:[%s5025_s4 + $0xc8] sm:$0xff]   ;;  %v4114_v38 = vld [vmem:[%s5025_s4 + $0xc0] sm:$0xff]  }
 0x1b7   : >> { %3826 = vmatprep.subr.bf16.mxu1 %v4182_v0  ;;  %v2025_v37 = vld [vmem:[%s4750_s24 + $0x2] sm:$0xff]  ;;  %v2026_v39 = vld [vmem:[%s4750_s24 + $0xa] sm:$0x7f]  ;;  %v3227_v40 = vld [vmem:[%s4750_s24 + $0x18] sm:$0xff] }
 0x1b8   : >> { %v3228_v41 = vld [vmem:[%s4750_s24 + $0x20] sm:$0x7f]  ;;  %v2027_v42 = vpack.c.bf16 %v2026_v39, %v2025_v37  ;;  %v4115_v43 = vld [vmem:[%s5025_s4 + $0x138] sm:$0xff]   ;;  %v4117_v46 = vld [vmem:[%s5025_s4 + $0x130] sm:$0xff]  }
 0x1b9   : >> { %3807 = vmatpush3.bf16.msra.mxu0 %v4089_v7  ;;  %v2141_v44 = vpack.c.bf16 %v3228_v41, %v3227_v40  ;;  %v4116_v45 = vld [vmem:[%s5025_s4 + $0x178] sm:$0xff]   ;;  %v4118_v47 = vld [vmem:[%s5025_s4 + $0x170] sm:$0xff]   ;;  %v4119_v48 = vld [vmem:[%s5025_s4 + $0x128] sm:$0xff]  }
 0x1ba   : >> { %3827 = vmatpush3.bf16.msra.mxu1 %v4090_v8  ;;  %3808 = vmatprep.subr.bf16.mxu0 %v4182_v0  ;;  %v4120_v49 = vld [vmem:[%s5025_s4 + $0x168] sm:$0xff]   ;;  %v4121_v50 = vld [vmem:[%s5025_s4 + $0x120] sm:$0xff]   ;;  %v4123_v52 = vld [vmem:[%s5025_s4 + $0x118] sm:$0xff]  }
 0x1bb   : >> { %3828 = vmatprep.subr.bf16.mxu1 %v4182_v0  ;;  %v4122_v51 = vld [vmem:[%s5025_s4 + $0x160] sm:$0xff]   ;;  %v4124_v53 = vld [vmem:[%s5025_s4 + $0x158] sm:$0xff]   ;;  %v4125_v54 = vld [vmem:[%s5025_s4 + $0x110] sm:$0xff]  }
 0x1bc   : >> { %v4126_v55 = vld [vmem:[%s5025_s4 + $0x150] sm:$0xff]   ;;  %v4127_v56 = vld [vmem:[%s5025_s4 + $0x108] sm:$0xff]   ;;  %v4129_v58 = vld [vmem:[%s5025_s4 + $0x100] sm:$0xff]  }
 0x1bd   : >> { %3809 = vmatpush3.bf16.msra.mxu0 %v4091_v9  ;;  %v4128_v57 = vld [vmem:[%s5025_s4 + $0x148] sm:$0xff]   ;;  %v3253_v59 = vld [vmem:[%s4750_s24 + $0x19] sm:$0xff]  ;;  %v3254_v60 = vld [vmem:[%s4750_s24 + $0x21] sm:$0x7f] }
 0x1be   : >> { %3829 = vmatpush3.bf16.msra.mxu1 %v4092_v10  ;;  %3810 = vmatprep.subr.bf16.mxu0 %v4182_v0  ;;  %v4130_v61 = vld [vmem:[%s5025_s4 + $0x140] sm:$0xff]   ;;  %v2252_v1 = vpack.c.bf16 %v3254_v60, %v3253_v59  ;;  %v4131_v3 = vld [vmem:[%s5025_s4 + $0x1b8] sm:$0xff]   ;;  %v4133_v6 = vld [vmem:[%s5025_s4 + $0x1b0] sm:$0xff]  }
 0x1bf   : >> { %3830 = vmatprep.subr.bf16.mxu1 %v4182_v0  ;;  %v3279_v62 = vld [vmem:[%s4750_s24 + $0x1a] sm:$0xff]  ;;  %v3280_v63 = vld [vmem:[%s4750_s24 + $0x22] sm:$0x7f]  ;;  %v4134_v7 = vld [vmem:[%s5025_s4 + $0x1f0] sm:$0xff]  }
 0x1c0   : >> { %v2363_v4 = vpack.c.bf16 %v3280_v63, %v3279_v62  ;;  %v4132_v5 = vld [vmem:[%s5025_s4 + $0x1f8] sm:$0xff]   ;;  %v4135_v8 = vld [vmem:[%s5025_s4 + $0x1a8] sm:$0xff]   ;;  %v4137_v10 = vld [vmem:[%s5025_s4 + $0x1a0] sm:$0xff]  }
 0x1c1   : >> { %3811 = vmatpush3.bf16.msra.mxu0 %v4093_v11  ;;  %v4136_v9 = vld [vmem:[%s5025_s4 + $0x1e8] sm:$0xff]   ;;  %v4138_v11 = vld [vmem:[%s5025_s4 + $0x1e0] sm:$0xff]   ;;  %v3305_v19 = vld [vmem:[%s4750_s24 + $0x30] sm:$0xff] }
 0x1c2   : >> { %3831 = vmatpush3.bf16.msra.mxu1 %v4094_v12  ;;  %3812 = vmatprep.subr.bf16.mxu0 %v4182_v0  ;;  %v4139_v12 = vld [vmem:[%s5025_s4 + $0x198] sm:$0xff]   ;;  %v4143_v16 = vld [vmem:[%s5025_s4 + $0x188] sm:$0xff]   ;;  %v4145_v18 = vld [vmem:[%s5025_s4 + $0x180] sm:$0xff]  }
 0x1c3   : >> { %3832 = vmatprep.subr.bf16.mxu1 %v4182_v0  ;;  %v3306_v20 = vld [vmem:[%s4750_s24 + $0x38] sm:$0x7f] }
 0x1c5   : >> { %3813 = vmatpush3.bf16.msra.mxu0 %v4095_v13  ;;  %v4140_v13 = vld [vmem:[%s5025_s4 + $0x1d8] sm:$0xff]  }
 0x1c6   : >> { %3833 = vmatpush3.bf16.msra.mxu1 %v4096_v14  ;;  %3814 = vmatprep.subr.bf16.mxu0 %v4182_v0  ;;  %v4141_v14 = vld [vmem:[%s5025_s4 + $0x190] sm:$0xff]  }
 0x1c7   : >> { %3834 = vmatprep.subr.bf16.mxu1 %v4182_v0 }
 0x1c9   : >> { %3815 = vmatpush3.bf16.msra.mxu0 %v4097_v15  ;;  %v4142_v15 = vld [vmem:[%s5025_s4 + $0x1d0] sm:$0xff]  }
 0x1ca   : >> { %3835 = vmatpush3.bf16.msra.mxu1 %v4098_v17  ;;  %3840 = vmatprep.subr.bf16.mxu0 %v4182_v0  ;;  %v4144_v17 = vld [vmem:[%s5025_s4 + $0x1c8] sm:$0xff]  }
 0x1cb   : >> { %3860 = vmatprep.subr.bf16.mxu1 %v4182_v0 }
 0x1cc   : >> { %3817 = vmatmul.mubr.bf16.vlgmr.msra.gmra.mxu0 %v1829_v21  ;;  %v4146_v21 = vld [vmem:[%s5025_s4 + $0x1c0] sm:$0xff]  }
 0x1cd   : >> { %3837 = vmatmul.mubr.bf16.vlgmr.msra.gmra.mxu1 %v1810_v22  ;;  %3841 = vmatpush3.bf16.msra.mxu0 %v4099_v23  ;;  %v3331_v22 = vld [vmem:[%s4750_s24 + $0x31] sm:$0xff]  ;;  %v3332_v23 = vld [vmem:[%s4750_s24 + $0x39] sm:$0x7f] }
 0x1ce   : >> { %3861 = vmatpush3.bf16.msra.mxu1 %v4100_v24  ;;  %3842 = vmatprep.subr.bf16.mxu0 %v4182_v0  ;;  %v2477_v24 = vpack.c.bf16 %v3306_v20, %v3305_v19 }
 0x1cf   : >> { %3862 = vmatprep.subr.bf16.mxu1 %v4182_v0  ;;  %3856 = vmatprep.mubr.msk.bf16.mxu0 %vm4183_vm3, %v4182_v0 }
 0x1d0   : >> { %3876 = vmatprep.mubr.msk.bf16.mxu1 %vm4183_vm3, %v4182_v0 }
 0x1d1   : >> { %3843 = vmatpush3.bf16.msra.mxu0 %v4101_v25  ;;  %v4147_v25 = vld [vmem:[%s5025_s4 + $0x238] sm:$0xff]  }
 0x1d2   : >> { %3863 = vmatpush3.bf16.msra.mxu1 %v4102_v26  ;;  %3844 = vmatprep.subr.bf16.mxu0 %v4182_v0  ;;  %v2588_v26 = vpack.c.bf16 %v3332_v23, %v3331_v22 }
 0x1d3   : >> { %3864 = vmatprep.subr.bf16.mxu1 %v4182_v0 }
 0x1d5   : >> { %3845 = vmatpush3.bf16.msra.mxu0 %v4103_v27  ;;  %v4148_v27 = vld [vmem:[%s5025_s4 + $0x230] sm:$0xff]  }
 0x1d6   : >> { %3865 = vmatpush3.bf16.msra.mxu1 %v4104_v28  ;;  %3846 = vmatprep.subr.bf16.mxu0 %v4182_v0  ;;  %v4149_v28 = vld [vmem:[%s5025_s4 + $0x228] sm:$0xff]  }
 0x1d7   : >> { %3866 = vmatprep.subr.bf16.mxu1 %v4182_v0 }
 0x1d9   : >> { %3847 = vmatpush3.bf16.msra.mxu0 %v4105_v29  ;;  %v4150_v29 = vld [vmem:[%s5025_s4 + $0x220] sm:$0xff]  }
 0x1da   : >> { %3867 = vmatpush3.bf16.msra.mxu1 %v4106_v30  ;;  %3848 = vmatprep.subr.bf16.mxu0 %v4182_v0  ;;  %v4151_v30 = vld [vmem:[%s5025_s4 + $0x218] sm:$0xff]  }
 0x1db   : >> { %3868 = vmatprep.subr.bf16.mxu1 %v4182_v0 }
 0x1dd   : >> { %3849 = vmatpush3.bf16.msra.mxu0 %v4107_v31  ;;  %v4152_v31 = vld [vmem:[%s5025_s4 + $0x210] sm:$0xff]  }
 0x1de   : >> { %3869 = vmatpush3.bf16.msra.mxu1 %v4108_v32  ;;  %3850 = vmatprep.subr.bf16.mxu0 %v4182_v0  ;;  %v4153_v32 = vld [vmem:[%s5025_s4 + $0x208] sm:$0xff]  }
 0x1df   : >> { %3870 = vmatprep.subr.bf16.mxu1 %v4182_v0 }
 0x1e1   : >> { %3851 = vmatpush3.bf16.msra.mxu0 %v4109_v33  ;;  %v4154_v33 = vld [vmem:[%s5025_s4 + $0x200] sm:$0xff]  }
 0x1e2   : >> { %3871 = vmatpush3.bf16.msra.mxu1 %v4110_v34  ;;  %3852 = vmatprep.subr.bf16.mxu0 %v4182_v0  ;;  %v3357_v34 = vld [vmem:[%s4750_s24 + $0x32] sm:$0xff] }
 0x1e3   : >> { %3872 = vmatprep.subr.bf16.mxu1 %v4182_v0 }
 0x1e5   : >> { %3853 = vmatpush3.bf16.msra.mxu0 %v4111_v2  ;;  %v3358_v2 = vld [vmem:[%s4750_s24 + $0x3a] sm:$0x7f]  ;;  %s3383_s24 = sshll.u32 %s4177_s16, 4  ;;  %s1805_s16 = sadd.s32 1, %s4177_s16  }
 0x1e6   : >> { %3873 = vmatpush3.bf16.msra.mxu1 %v4112_v35  ;;  %3854 = vmatprep.subr.bf16.mxu0 %v4182_v0  ;;  %v2699_v35 = vpack.c.bf16 %v3358_v2, %v3357_v34  ;;  %s2811_s12 = scalar_lea.vmem %s4245_s6, %s3383_s24  ;;  %p1802_p5 = scmp.ge.s32.totalorder %s1805_s16, 15  }
 0x1e7   : >> { %3874 = vmatprep.subr.bf16.mxu1 %v4182_v0 }
 0x1e9   : >> { %3855 = vmatpush3.bf16.msra.mxu0 %v4113_v36 }
 0x1ea   : >> { %3875 = vmatpush3.bf16.msra.mxu1 %v4114_v38  ;;  %3880 = vmatprep.subr.bf16.mxu0 %v4182_v0 }
 0x1eb   : >> { %3900 = vmatprep.subr.bf16.mxu1 %v4182_v0 }
 0x1ec   : >> { %3857 = vmatmul.mubr.bf16.vlgmr.msra.gmra.mxu0 %v2027_v42 }
 0x1ed   : >> { %3881 = vmatpush3.bf16.msra.mxu0 %v4115_v43  ;;  %3877 = vmatmul.mubr.bf16.vlgmr.msra.gmra.mxu1 %v2141_v44 }
 0x1ee   : >> { %3901 = vmatpush3.bf16.msra.mxu1 %v4116_v45  ;;  %3882 = vmatprep.subr.bf16.mxu0 %v4182_v0 }
 0x1ef   : >> { %3902 = vmatprep.subr.bf16.mxu1 %v4182_v0  ;;  %3896 = vmatprep.mubr.msk.bf16.mxu0 %vm4183_vm3, %v4182_v0 }
 0x1f0   : >> { %3916 = vmatprep.mubr.msk.bf16.mxu1 %vm4183_vm3, %v4182_v0 }
 0x1f1   : >> { %3883 = vmatpush3.bf16.msra.mxu0 %v4117_v46 }
 0x1f2   : >> { %3903 = vmatpush3.bf16.msra.mxu1 %v4118_v47  ;;  %3884 = vmatprep.subr.bf16.mxu0 %v4182_v0 }
 0x1f3   : >> { %3904 = vmatprep.subr.bf16.mxu1 %v4182_v0 }
 0x1f5   : >> { %3885 = vmatpush3.bf16.msra.mxu0 %v4119_v48 }
 0x1f6   : >> { %3905 = vmatpush3.bf16.msra.mxu1 %v4120_v49  ;;  %3886 = vmatprep.subr.bf16.mxu0 %v4182_v0 }
 0x1f7   : >> { %3906 = vmatprep.subr.bf16.mxu1 %v4182_v0 }
 0x1f9   : >> { %3887 = vmatpush3.bf16.msra.mxu0 %v4121_v50 }
 0x1fa   : >> { %3907 = vmatpush3.bf16.msra.mxu1 %v4122_v51  ;;  %3888 = vmatprep.subr.bf16.mxu0 %v4182_v0 }
 0x1fb   : >> { %3908 = vmatprep.subr.bf16.mxu1 %v4182_v0 }
 0x1fd   : >> { %3889 = vmatpush3.bf16.msra.mxu0 %v4123_v52 }
 0x1fe   : >> { %3909 = vmatpush3.bf16.msra.mxu1 %v4124_v53  ;;  %3890 = vmatprep.subr.bf16.mxu0 %v4182_v0 }
 0x1ff   : >> { %3910 = vmatprep.subr.bf16.mxu1 %v4182_v0 }
 0x201   : >> { %3891 = vmatpush3.bf16.msra.mxu0 %v4125_v54 }
 0x202   : >> { %3911 = vmatpush3.bf16.msra.mxu1 %v4126_v55  ;;  %3892 = vmatprep.subr.bf16.mxu0 %v4182_v0 }
 0x203   : >> { %3912 = vmatprep.subr.bf16.mxu1 %v4182_v0 }
 0x205   : >> { %3893 = vmatpush3.bf16.msra.mxu0 %v4127_v56 }
 0x206   : >> { %3913 = vmatpush3.bf16.msra.mxu1 %v4128_v57  ;;  %3894 = vmatprep.subr.bf16.mxu0 %v4182_v0 }
 0x207   : >> { %3914 = vmatprep.subr.bf16.mxu1 %v4182_v0 }
 0x209   : >> { %3895 = vmatpush3.bf16.msra.mxu0 %v4129_v58 }
 0x20a   : >> { %3915 = vmatpush3.bf16.msra.mxu1 %v4130_v61  ;;  %3920 = vmatprep.subr.bf16.mxu0 %v4182_v0 }
 0x20b   : >> { %3940 = vmatprep.subr.bf16.mxu1 %v4182_v0 }
 0x20c   : >> { %3897 = vmatmul.mubr.bf16.vlgmr.msra.gmra.mxu0 %v2252_v1 }
 0x20d   : >> { %3921 = vmatpush3.bf16.msra.mxu0 %v4131_v3  ;;  %3917 = vmatmul.mubr.bf16.vlgmr.msra.gmra.mxu1 %v2363_v4 }
 0x20e   : >> { %3941 = vmatpush3.bf16.msra.mxu1 %v4132_v5  ;;  %3922 = vmatprep.subr.bf16.mxu0 %v4182_v0 }
 0x20f   : >> { %3942 = vmatprep.subr.bf16.mxu1 %v4182_v0  ;;  %3936 = vmatprep.mubr.msk.bf16.mxu0 %vm4183_vm3, %v4182_v0 }
 0x210   : >> { %3956 = vmatprep.mubr.msk.bf16.mxu1 %vm4183_vm3, %v4182_v0 }
 0x211   : >> { %3923 = vmatpush3.bf16.msra.mxu0 %v4133_v6 }
 0x212   : >> { %3943 = vmatpush3.bf16.msra.mxu1 %v4134_v7  ;;  %3924 = vmatprep.subr.bf16.mxu0 %v4182_v0 }
 0x213   : >> { %3944 = vmatprep.subr.bf16.mxu1 %v4182_v0 }
 0x215   : >> { %3925 = vmatpush3.bf16.msra.mxu0 %v4135_v8 }
 0x216   : >> { %3945 = vmatpush3.bf16.msra.mxu1 %v4136_v9  ;;  %3926 = vmatprep.subr.bf16.mxu0 %v4182_v0 }
 0x217   : >> { %3946 = vmatprep.subr.bf16.mxu1 %v4182_v0 }
 0x219   : >> { %3927 = vmatpush3.bf16.msra.mxu0 %v4137_v10 }
 0x21a   : >> { %3947 = vmatpush3.bf16.msra.mxu1 %v4138_v11  ;;  %3928 = vmatprep.subr.bf16.mxu0 %v4182_v0 }
 0x21b   : >> { %3948 = vmatprep.subr.bf16.mxu1 %v4182_v0 }
 0x21d   : >> { %3929 = vmatpush3.bf16.msra.mxu0 %v4139_v12 }
 0x21e   : >> { %3949 = vmatpush3.bf16.msra.mxu1 %v4140_v13  ;;  %3930 = vmatprep.subr.bf16.mxu0 %v4182_v0 }
 0x21f   : >> { %3950 = vmatprep.subr.bf16.mxu1 %v4182_v0 }
 0x221   : >> { %3931 = vmatpush3.bf16.msra.mxu0 %v4141_v14 }
 0x222   : >> { %3951 = vmatpush3.bf16.msra.mxu1 %v4142_v15  ;;  %3932 = vmatprep.subr.bf16.mxu0 %v4182_v0 }
 0x223   : >> { %3952 = vmatprep.subr.bf16.mxu1 %v4182_v0 }
 0x225   : >> { %3933 = vmatpush3.bf16.msra.mxu0 %v4143_v16 }
 0x226   : >> { %3953 = vmatpush3.bf16.msra.mxu1 %v4144_v17  ;;  %3934 = vmatprep.subr.bf16.mxu0 %v4182_v0 }
 0x227   : >> { %3954 = vmatprep.subr.bf16.mxu1 %v4182_v0 }
 0x229   : >> { %3935 = vmatpush3.bf16.msra.mxu0 %v4145_v18 }
 0x22a   : >> { %3955 = vmatpush3.bf16.msra.mxu1 %v4146_v21  ;;  %3960 = vmatprep.subr.bf16.mxu0 %v4182_v0 }
 0x22c   : >> { %3937 = vmatmul.mubr.bf16.vlgmr.msra.gmra.mxu0 %v2477_v24 }
 0x22d   : >> { %3961 = vmatpush3.bf16.msra.mxu0 %v4147_v25  ;;  %3957 = vmatmul.mubr.bf16.vlgmr.msra.gmra.mxu1 %v2588_v26 }
 0x22e   : >> { %3962 = vmatprep.subr.bf16.mxu0 %v4182_v0  ;;  %3976 = vmatprep.mubr.msk.bf16.mxu0 %vm4183_vm3, %v4182_v0 }
 0x231   : >> { %3963 = vmatpush3.bf16.msra.mxu0 %v4148_v27 }
 0x232   : >> { %3964 = vmatprep.subr.bf16.mxu0 %v4182_v0 }
 0x235   : >> { %3965 = vmatpush3.bf16.msra.mxu0 %v4149_v28 }
 0x236   : >> { %3966 = vmatprep.subr.bf16.mxu0 %v4182_v0 }
 0x239   : >> { %3967 = vmatpush3.bf16.msra.mxu0 %v4150_v29 }
 0x23a   : >> { %3968 = vmatprep.subr.bf16.mxu0 %v4182_v0 }
 0x23d   : >> { %3969 = vmatpush3.bf16.msra.mxu0 %v4151_v30 }
 0x23e   : >> { %3970 = vmatprep.subr.bf16.mxu0 %v4182_v0 }
 0x241   : >> { %3971 = vmatpush3.bf16.msra.mxu0 %v4152_v31 }
 0x242   : >> { %3972 = vmatprep.subr.bf16.mxu0 %v4182_v0 }
 0x245   : >> { %3973 = vmatpush3.bf16.msra.mxu0 %v4153_v32 }
 0x246   : >> { %3974 = vmatprep.subr.bf16.mxu0 %v4182_v0 }
 0x249   : >> { %3975 = vmatpush3.bf16.msra.mxu0 %v4154_v33 }
 0x24c   : >> { %3977 = vmatmul.mubr.bf16.vlgmr.msra.gmra.mxu0 %v2699_v35 }
 0x28c   : >> { %v1929_v36 = vpop.f32.mrf.mxu0 }
 0x28d   : >> { %v2018_v37 = vpop.f32.mrf.mxu1 }
 0x28e   : >> { %v2019_v38 = vadd.f32 %v2018_v37, %v1929_v36  ;;  %v3818_v39 = vpop.f32.mrf.mxu0 }
 0x28f   : >> { %v3838_v40 = vpop.f32.mrf.mxu1 }
 0x290   : >> { %v1932_v41 = vpop.f32.mrf.mxu0 }
 0x291   : >> { %v2021_v42 = vpop.f32.mrf.mxu1 }
 0x292   : >> { %v2022_v43 = vadd.f32 %v2021_v42, %v1932_v41  ;;  %v3819_v44 = vpop.f32.mrf.mxu0 }
 0x293   : >> { %v3839_v45 = vpop.f32.mrf.mxu1 }
 0x2ac   : >> { %v2127_v46 = vpop.f32.mrf.mxu0 }
 0x2ad   : >> { %v2134_v47 = vadd.f32 %v2127_v46, %v2019_v38  ;;  %v2241_v48 = vpop.f32.mrf.mxu1 }
 0x2ae   : >> { %v3858_v49 = vpop.f32.mrf.mxu0 }
 0x2af   : >> { %v2248_v50 = vadd.f32 %v2241_v48, %v2134_v47  ;;  %v3878_v51 = vpop.f32.mrf.mxu1 }
 0x2b0   : >> { %v2130_v0 = vpop.f32.mrf.mxu0 }
 0x2b1   : >> { %v2135_v52 = vadd.f32 %v2130_v0, %v2022_v43  ;;  %v2244_v53 = vpop.f32.mrf.mxu1 }
 0x2b2   : >> { %v3859_v54 = vpop.f32.mrf.mxu0 }
 0x2b3   : >> { %v2249_v55 = vadd.f32 %v2244_v53, %v2135_v52  ;;  %v3879_v56 = vpop.f32.mrf.mxu1 }
 0x2cc   : >> { %v2352_v57 = vpop.f32.mrf.mxu0 }
 0x2cd   : >> { %v2463_v58 = vpop.f32.mrf.mxu1  ;;  %v2359_v11 = vadd.f32 %v2352_v57, %v2248_v50 }
 0x2ce   : >> { %v3898_v59 = vpop.f32.mrf.mxu0 }
 0x2cf   : >> { %v3918_v60 = vpop.f32.mrf.mxu1  ;;  %v2470_v12 = vadd.f32 %v2463_v58, %v2359_v11 }
 0x2d0   : >> { %v2355_v61 = vpop.f32.mrf.mxu0 }
 0x2d1   : >> { %v2466_v62 = vpop.f32.mrf.mxu1  ;;  %v2360_v13 = vadd.f32 %v2355_v61, %v2249_v55 }
 0x2d2   : >> { %v3899_v63 = vpop.f32.mrf.mxu0 }
 0x2d3   : >> { %v3919_v1 = vpop.f32.mrf.mxu1  ;;  %v2471_v15 = vadd.f32 %v2466_v62, %v2360_v13 }
 0x2ec   : >> { %v2577_v3 = vpop.f32.mrf.mxu0 }
 0x2ed   : >> { %v2688_v4 = vpop.f32.mrf.mxu1  ;;  %v2584_v14 = vadd.f32 %v2577_v3, %v2470_v12 }
 0x2ee   : >> { %v3938_v5 = vpop.f32.mrf.mxu0 }
 0x2ef   : >> { %v3958_v6 = vpop.f32.mrf.mxu1  ;;  %v2695_v16 = vadd.f32 %v2688_v4, %v2584_v14 }
 0x2f0   : >> { %v2580_v7 = vpop.f32.mrf.mxu0 }
 0x2f1   : >> { %v2691_v8 = vpop.f32.mrf.mxu1  ;;  %v2585_v17 = vadd.f32 %v2580_v7, %v2471_v15 }
 0x2f2   : >> { %v3939_v9 = vpop.f32.mrf.mxu0 }
 0x2f3   : >> { %v3959_v10 = vpop.f32.mrf.mxu1  ;;  %v2696_v21 = vadd.f32 %v2691_v8, %v2585_v17 }
 0x30c   : >> { %v2799_v18 = vpop.f32.mrf.mxu0 }
 0x30d   : >> { %v2806_v19 = vadd.f32 %v2799_v18, %v2695_v16 }
 0x30e   : >> { %v3978_v20 = vpop.f32.mrf.mxu0 }
 0x30f   : >> { %v2808_v22 = vmax.f32 %v2806_v19, 0.0 }
 0x310   : >> { %v2802_v23 = vpop.f32.mrf.mxu0 }
 0x311   : >> { %2812 = vst [vmem:[%s2811_s12] sm:$0xff] %v2808_v22  ;;  %v2807_v24 = vadd.f32 %v2802_v23, %v2696_v21  ;;  %1804 = sbr.rel (!%p1802_p5) target bundleno = 427 (0x1ab), region = 133 }
 0x312   : >> { %v3979_v25 = vpop.f32.mrf.mxu0 }
 0x313   : >> { %v2809_v26 = vmax.f32 %v2807_v24, 0.0 }
 0x315   : >> { %2813 = vst [vmem:[%s2811_s12 + $0x8] sm:$0x7f] %v2809_v26 }
 0x316 PF: > { %s15_s18 = sadd.s32 1, %s4169_s18  }
 0x317   : > { %p12_p6 = scmp.ge.s32.totalorder %s15_s18, 4  }
 0x319   :  { %14 = sbr.rel (!%p12_p6) target bundleno = 1 (0x1), region = 144 }

</bundles_post_ra>
